<compile_context>
chip_gen: v7x
topology: tpu7x:2x2x1
jax: 0.10.0
libtpu: 0.0.40
codegen_flags: <defaults>
</compile_context>

<pallas_src>
import jax
import jax.numpy as jnp
from jax import lax
from jax.experimental import pallas as pl
from jax.experimental.pallas import tpu as pltpu


def fused_kernel(x_ref, s_ref, w_ref, gamma_ref, beta_ref, o_ref):
    # Hardsigmoid: clip(x/6 + 1/2, 0, 1), folded into the conv weight columns.
    gate = jnp.clip(s_ref[...] * (1.0 / 6.0) + 0.5, 0.0, 1.0)            # (1, Cin)
    w = w_ref[...] * gate                                                # (Cout, Cin)

    # 1x1 conv == channels-first matmul on the MXU: (Cout, Cin) @ (Cin, HW) -> (Cout, HW)
    y = jnp.dot(w, x_ref[...], preferred_element_type=jnp.float32)       # (Cout, HW)

    # BatchNorm2d (training mode), one-pass stats over the spatial (lane) axis.
    hw = y.shape[1]
    inv_hw = 1.0 / hw
    mean = jnp.sum(y, axis=1, keepdims=True) * inv_hw                    # (Cout, 1)
    ex2 = jnp.sum(y * y, axis=1, keepdims=True) * inv_hw                 # (Cout, 1)
    var = jnp.maximum(ex2 - mean * mean, 0.0)                            # biased variance, >= 0
    inv = lax.rsqrt(var + 1e-3)

    scale = inv * gamma_ref[...]                                         # (Cout, 1)
    shift = beta_ref[...] - mean * scale                                 # (Cout, 1)
    o_ref[...] = (y * scale + shift).astype(o_ref.dtype)                 # single FMA sweep


def m_forward(x131, x127, conv_w, bn_gamma, bn_beta):
    """x131: (N, Cin, 1, 1), x127: (N, Cin, H, W), conv_w: (Cout, Cin, 1, 1)."""
    N, Cin, H, W = x127.shape
    Cout = conv_w.shape[0]
    # TODO(synk): channels-first fast path assumes N == 1 (matches the module spec); for N > 1
    # the SE gate is per-sample and the BN stats span the batch — would need a batched variant.
    assert N == 1, "kernel specialized for batch size 1 (as in the reference module)"
    HW = H * W

    x = x127.reshape(Cin, HW)                # contiguous reshape — no transpose
    s = x131.reshape(1, Cin)
    w = conv_w.reshape(Cout, Cin)
    g = bn_gamma.reshape(Cout, 1)
    b = bn_beta.reshape(Cout, 1)

    vmem_spec = pl.BlockSpec(memory_space=pltpu.MemorySpace.VMEM)
    out = pl.pallas_call(
        fused_kernel,
        out_shape=jax.ShapeDtypeStruct((Cout, HW), jnp.float32),
        in_specs=[vmem_spec] * 5,
        out_specs=vmem_spec,
    )(x, s, w, g, b)

    return out.reshape(N, Cout, H, W)        # contiguous reshape back to NCHW


def reference_forward(x131, x127, conv_w, bn_gamma, bn_beta):
    """Plain-JAX reference matching PyTorch semantics (two-pass BN stats)."""
    gate = jnp.clip(x131 / 6.0 + 0.5, 0.0, 1.0)                          # hardsigmoid
    x = gate * x127                                                      # broadcast mul
    y = jnp.einsum("nchw,oc->nohw", x, conv_w.reshape(conv_w.shape[0], conv_w.shape[1]))
    mean = jnp.mean(y, axis=(0, 2, 3), keepdims=True)
    var = jnp.mean(jnp.square(y - mean), axis=(0, 2, 3), keepdims=True)
    inv = lax.rsqrt(var + 1e-3)
    return (y - mean) * inv * bn_gamma.reshape(1, -1, 1, 1) + bn_beta.reshape(1, -1, 1, 1)


if __name__ == "__main__":
    N, Cin, Cout, H, W = 1, 672, 112, 14, 14

    key = jax.random.PRNGKey(0)
    k1, k2, k3, k4, k5 = jax.random.split(key, 5)

    x127 = jax.random.normal(k1, (N, Cin, H, W), dtype=jnp.float32)
    x131 = jax.random.normal(k2, (N, Cin, 1, 1), dtype=jnp.float32)
    conv_w = jax.random.normal(k3, (Cout, Cin, 1, 1), dtype=jnp.float32) * (2.0 / Cin) ** 0.5
    bn_gamma = 1.0 + 0.1 * jax.random.normal(k4, (Cout,), dtype=jnp.float32)
    bn_beta = 0.1 * jax.random.normal(k5, (Cout,), dtype=jnp.float32)

    out = jax.block_until_ready(m_forward(x131, x127, conv_w, bn_gamma, bn_beta))
    ref = jax.block_until_ready(reference_forward(x131, x127, conv_w, bn_gamma, bn_beta))

    assert out.shape == (N, Cout, H, W), out.shape
    assert jnp.allclose(out, ref, atol=2e-3, rtol=2e-3), float(jnp.max(jnp.abs(out - ref)))

    print("KERNEL_OK")
</pallas_src>

<mosaic_0001>
module attributes {stable_mosaic.version = 11 : i64} {
  func.func @fused_kernel(%arg0: memref<672x196xf32, #tpu.memory_space<vmem>>, %arg1: memref<1x672xf32, #tpu.memory_space<vmem>>, %arg2: memref<112x672xf32, #tpu.memory_space<vmem>>, %arg3: memref<112x1xf32, #tpu.memory_space<vmem>>, %arg4: memref<112x1xf32, #tpu.memory_space<vmem>>, %arg5: memref<112x196xf32, #tpu.memory_space<vmem>>) attributes {dimension_semantics = [], scalar_prefetch = 0 : i64, scratch_operands = 0 : i64, tpu.core_type = #tpu.core_type<tc>} {
    %c0 = arith.constant 0 : index
    %c0_0 = arith.constant 0 : index
    %0 = vector.load %arg1[%c0, %c0_0] : memref<1x672xf32, #tpu.memory_space<vmem>>, vector<1x672xf32>
    %cst = arith.constant 0.166666672 : f32
    %1 = vector.broadcast %cst : f32 to vector<1x672xf32>
    %2 = arith.mulf %0, %1 : vector<1x672xf32>
    %cst_1 = arith.constant 5.000000e-01 : f32
    %3 = vector.broadcast %cst_1 : f32 to vector<1x672xf32>
    %4 = arith.addf %2, %3 : vector<1x672xf32>
    %cst_2 = arith.constant 0.000000e+00 : f32
    %cst_3 = arith.constant 1.000000e+00 : f32
    %5 = vector.broadcast %cst_2 : f32 to vector<1x672xf32>
    %6 = arith.maximumf %5, %4 : vector<1x672xf32>
    %7 = vector.broadcast %cst_3 : f32 to vector<1x672xf32>
    %8 = arith.minimumf %7, %6 : vector<1x672xf32>
    %c0_4 = arith.constant 0 : index
    %c0_5 = arith.constant 0 : index
    %9 = vector.load %arg2[%c0_4, %c0_5] : memref<112x672xf32, #tpu.memory_space<vmem>>, vector<112x672xf32>
    %10 = vector.broadcast %8 : vector<1x672xf32> to vector<112x672xf32>
    %11 = arith.mulf %9, %10 : vector<112x672xf32>
    %c0_6 = arith.constant 0 : index
    %c0_7 = arith.constant 0 : index
    %12 = vector.load %arg0[%c0_6, %c0_7] : memref<672x196xf32, #tpu.memory_space<vmem>>, vector<672x196xf32>
    %cst_8 = arith.constant dense<0.000000e+00> : vector<112x196xf32>
    %13 = tpu.matmul %11, %12, %cst_8 {dimension_numbers = #tpu.dot_dimension_numbers<[1], [0], [0], [1], [0, 0, 1, 1], [], []>} : vector<112x672xf32>, vector<672x196xf32>, vector<112x196xf32> -> vector<112x196xf32>
    %cst_9 = arith.constant dense<0.000000e+00> : vector<112xf32>
    %14 = vector.multi_reduction <add>, %13, %cst_9 [1] : vector<112x196xf32> to vector<112xf32>
    %15 = vector.shape_cast %14 : vector<112xf32> to vector<112x1xf32>
    %cst_10 = arith.constant 0.00510204071 : f32
    %16 = vector.broadcast %cst_10 : f32 to vector<112x1xf32>
    %17 = arith.mulf %15, %16 : vector<112x1xf32>
    %18 = arith.mulf %13, %13 : vector<112x196xf32>
    %cst_11 = arith.constant dense<0.000000e+00> : vector<112xf32>
    %19 = vector.multi_reduction <add>, %18, %cst_11 [1] : vector<112x196xf32> to vector<112xf32>
    %20 = vector.shape_cast %19 : vector<112xf32> to vector<112x1xf32>
    %cst_12 = arith.constant 0.00510204071 : f32
    %21 = vector.broadcast %cst_12 : f32 to vector<112x1xf32>
    %22 = arith.mulf %20, %21 : vector<112x1xf32>
    %23 = arith.mulf %17, %17 : vector<112x1xf32>
    %24 = arith.subf %22, %23 : vector<112x1xf32>
    %cst_13 = arith.constant 0.000000e+00 : f32
    %25 = vector.broadcast %cst_13 : f32 to vector<112x1xf32>
    %26 = arith.maximumf %24, %25 : vector<112x1xf32>
    %cst_14 = arith.constant 1.000000e-03 : f32
    %27 = vector.broadcast %cst_14 : f32 to vector<112x1xf32>
    %28 = arith.addf %26, %27 : vector<112x1xf32>
    %29 = math.rsqrt %28 : vector<112x1xf32>
    %c0_15 = arith.constant 0 : index
    %c0_16 = arith.constant 0 : index
    %30 = vector.load %arg3[%c0_15, %c0_16] : memref<112x1xf32, #tpu.memory_space<vmem>>, vector<112x1xf32>
    %31 = arith.mulf %29, %30 : vector<112x1xf32>
    %c0_17 = arith.constant 0 : index
    %c0_18 = arith.constant 0 : index
    %32 = vector.load %arg4[%c0_17, %c0_18] : memref<112x1xf32, #tpu.memory_space<vmem>>, vector<112x1xf32>
    %33 = arith.mulf %17, %31 : vector<112x1xf32>
    %34 = arith.subf %32, %33 : vector<112x1xf32>
    %35 = vector.broadcast %31 : vector<112x1xf32> to vector<112x196xf32>
    %36 = arith.mulf %13, %35 : vector<112x196xf32>
    %37 = vector.broadcast %34 : vector<112x1xf32> to vector<112x196xf32>
    %38 = arith.addf %36, %37 : vector<112x196xf32>
    %c0_19 = arith.constant 0 : index
    %c0_20 = arith.constant 0 : index
    %39 = vector.load %arg5[%c0_19, %c0_20] : memref<112x196xf32, #tpu.memory_space<vmem>>, vector<112x196xf32>
    tpu.vector_store %arg5[%c0_19, %c0_20], %38 {strides = array<i32>} : memref<112x196xf32, #tpu.memory_space<vmem>>, vector<112x196xf32>,
    return
  }
}

</mosaic_0001>

<bundles_post_ra>
// kernel: tpu_custom_call.1
= control target key start
LH: loop header
LB: loop body
LE: loop exit
PB: predicated region body
PF: predicated region fallthrough
CT: control target
= control target key end

     0   :  { %vm392_vm0 = vcmask 261120   ;;  %vm882_vm1 = vcmask 556032   ;;  %s3252_s0 = inlined_call_operand.vmem [shape: f32[672,196], index: 0, kind: input, shape index: {}]   ;;  %s3253_s1 = inlined_call_operand.vmem [shape: f32[1,672], index: 1, kind: input, shape index: {}]   ;;  %s3254_s2 = inlined_call_operand.vmem [shape: f32[112,672], index: 2, kind: input, shape index: {}]   ;;  %s3255_s3 = inlined_call_operand.vmem [shape: f32[112,1], index: 3, kind: input, shape index: {}]   ;;  %s3256_s4 = inlined_call_operand.vmem [shape: f32[112,1], index: 4, kind: input, shape index: {}]   ;;  %s3257_s5 = inlined_call_operand.vmem [shape: f32[112,196], index: 5, kind: output, shape index: {}]  }
   0x1   :  { %v225_v0 = vld [vmem:[%s3252_s0 + $0x8] sm:$0xff]  ;;  %v227_v1 = vld [vmem:[%s3252_s0 + $0x18] sm:$0xff]  ;;  %v224_v5 = vld [vmem:[%s3252_s0] sm:$0xff] }
   0x2   :  { %v289_v2 = vld [vmem:[%s3252_s0 + $0x208] sm:$0xff]  ;;  %v1433_v3 = vpack.c.bf16 %v227_v1, %v225_v0  ;;  %v291_v4 = vld [vmem:[%s3252_s0 + $0x218] sm:$0xff]  ;;  %v226_v6 = vld [vmem:[%s3252_s0 + $0x10] sm:$0xff] }
   0x3   :  { %v1497_v7 = vpack.c.bf16 %v291_v4, %v289_v2  ;;  %v1435_v8 = vpack.c.bf16 %v226_v6, %v224_v5  ;;  %v288_v9 = vld [vmem:[%s3252_s0 + $0x200] sm:$0xff]  ;;  %v290_v10 = vld [vmem:[%s3252_s0 + $0x210] sm:$0xff]  ;;  %v229_v11 = vld [vmem:[%s3252_s0 + $0x28] sm:$0xff] }
   0x4   :  { %1434 = vmatprep.subr.bf16.mxu1 %v1433_v3  ;;  %v1499_v12 = vpack.c.bf16 %v290_v10, %v288_v9  ;;  %v231_v13 = vld [vmem:[%s3252_s0 + $0x38] sm:$0xff]  ;;  %v293_v14 = vld [vmem:[%s3252_s0 + $0x228] sm:$0xff]  ;;  %v228_v18 = vld [vmem:[%s3252_s0 + $0x20] sm:$0xff] }
   0x5   :  { %v295_v15 = vld [vmem:[%s3252_s0 + $0x238] sm:$0xff]  ;;  %1498 = vmatprep.subr.bf16.mxu0 %v1497_v7  ;;  %1436 = vmatpush1.bf16.msra.mxu1 %v1435_v8  ;;  %v1437_v16 = vpack.c.bf16 %v231_v13, %v229_v11  ;;  %v230_v19 = vld [vmem:[%s3252_s0 + $0x30] sm:$0xff]  ;;  %v292_v20 = vld [vmem:[%s3252_s0 + $0x220] sm:$0xff] }
   0x6   :  { %v1501_v17 = vpack.c.bf16 %v295_v15, %v293_v14  ;;  %1500 = vmatpush1.bf16.msra.mxu0 %v1499_v12  ;;  %v1439_v21 = vpack.c.bf16 %v230_v19, %v228_v18  ;;  %v294_v22 = vld [vmem:[%s3252_s0 + $0x230] sm:$0xff]  ;;  %v233_v23 = vld [vmem:[%s3252_s0 + $0x48] sm:$0xff]  ;;  %v235_v24 = vld [vmem:[%s3252_s0 + $0x58] sm:$0xff] }
   0x7   :  { %1438 = vmatprep.subr.bf16.mxu1 %v1437_v16  ;;  %v1503_v25 = vpack.c.bf16 %v294_v22, %v292_v20  ;;  %v1441_v26 = vpack.c.bf16 %v235_v24, %v233_v23  ;;  %v297_v27 = vld [vmem:[%s3252_s0 + $0x248] sm:$0xff]  ;;  %v299_v28 = vld [vmem:[%s3252_s0 + $0x258] sm:$0xff]  ;;  %v232_v29 = vld [vmem:[%s3252_s0 + $0x40] sm:$0xff] }
   0x8   :  { %1502 = vmatprep.subr.bf16.mxu0 %v1501_v17  ;;  %v1505_v30 = vpack.c.bf16 %v299_v28, %v297_v27  ;;  %v234_v31 = vld [vmem:[%s3252_s0 + $0x50] sm:$0xff]  ;;  %v296_v32 = vld [vmem:[%s3252_s0 + $0x240] sm:$0xff]  ;;  %v237_v35 = vld [vmem:[%s3252_s0 + $0x68] sm:$0xff] }
   0x9   :  { %v298_v33 = vld [vmem:[%s3252_s0 + $0x250] sm:$0xff]  ;;  %1440 = vmatpush1.bf16.msra.mxu1 %v1439_v21  ;;  %v1443_v34 = vpack.c.bf16 %v234_v31, %v232_v29  ;;  %v239_v36 = vld [vmem:[%s3252_s0 + $0x78] sm:$0xff]  ;;  %v301_v37 = vld [vmem:[%s3252_s0 + $0x268] sm:$0xff] }
   0xa   :  { %1504 = vmatpush1.bf16.msra.mxu0 %v1503_v25  ;;  %1442 = vmatprep.subr.bf16.mxu1 %v1441_v26  ;;  %v1507_v38 = vpack.c.bf16 %v298_v33, %v296_v32  ;;  %v1445_v39 = vpack.c.bf16 %v239_v36, %v237_v35  ;;  %v303_v40 = vld [vmem:[%s3252_s0 + $0x278] sm:$0xff]  ;;  %v236_v41 = vld [vmem:[%s3252_s0 + $0x60] sm:$0xff]  ;;  %v238_v42 = vld [vmem:[%s3252_s0 + $0x70] sm:$0xff] }
   0xb   :  { %1506 = vmatprep.subr.bf16.mxu0 %v1505_v30  ;;  %v1509_v43 = vpack.c.bf16 %v303_v40, %v301_v37  ;;  %v300_v44 = vld [vmem:[%s3252_s0 + $0x260] sm:$0xff]  ;;  %v302_v45 = vld [vmem:[%s3252_s0 + $0x270] sm:$0xff]  ;;  %v241_v46 = vld [vmem:[%s3252_s0 + $0x88] sm:$0xff]  ;;  %v1447_v50 = vpack.c.bf16 %v238_v42, %v236_v41 }
   0xc   :  { %v243_v47 = vld [vmem:[%s3252_s0 + $0x98] sm:$0xff]  ;;  %v305_v48 = vld [vmem:[%s3252_s0 + $0x288] sm:$0xff]  ;;  %v1511_v51 = vpack.c.bf16 %v302_v45, %v300_v44  ;;  %v240_v53 = vld [vmem:[%s3252_s0 + $0x80] sm:$0xff] }
   0xd   :  { %v307_v49 = vld [vmem:[%s3252_s0 + $0x298] sm:$0xff]  ;;  %1444 = vmatpush1.bf16.msra.mxu1 %v1443_v34  ;;  %v1449_v52 = vpack.c.bf16 %v243_v47, %v241_v46  ;;  %v242_v54 = vld [vmem:[%s3252_s0 + $0x90] sm:$0xff]  ;;  %v304_v55 = vld [vmem:[%s3252_s0 + $0x280] sm:$0xff] }
   0xe   :  { %1508 = vmatpush1.bf16.msra.mxu0 %v1507_v38  ;;  %1446 = vmatprep.subr.bf16.mxu1 %v1445_v39  ;;  %v1513_v56 = vpack.c.bf16 %v307_v49, %v305_v48  ;;  %v306_v57 = vld [vmem:[%s3252_s0 + $0x290] sm:$0xff]  ;;  %v245_v58 = vld [vmem:[%s3252_s0 + $0xa8] sm:$0xff]  ;;  %v247_v59 = vld [vmem:[%s3252_s0 + $0xb8] sm:$0xff]  ;;  %v1451_v62 = vpack.c.bf16 %v242_v54, %v240_v53 }
   0xf   :  { %1510 = vmatprep.subr.bf16.mxu0 %v1509_v43  ;;  %v309_v60 = vld [vmem:[%s3252_s0 + $0x2a8] sm:$0xff]  ;;  %v311_v61 = vld [vmem:[%s3252_s0 + $0x2b8] sm:$0xff]  ;;  %v1515_v63 = vpack.c.bf16 %v306_v57, %v304_v55  ;;  %v1453_v0 = vpack.c.bf16 %v247_v59, %v245_v58  ;;  %v244_v1 = vld [vmem:[%s3252_s0 + $0xa0] sm:$0xff] }
  0x10   :  { %v246_v2 = vld [vmem:[%s3252_s0 + $0xb0] sm:$0xff]  ;;  %v308_v3 = vld [vmem:[%s3252_s0 + $0x2a0] sm:$0xff]  ;;  %v1517_v4 = vpack.c.bf16 %v311_v61, %v309_v60  ;;  %v249_v6 = vld [vmem:[%s3252_s0 + $0xc8] sm:$0xff] }
  0x11   :  { %1448 = vmatpush1.bf16.msra.mxu1 %v1447_v50  ;;  %v310_v5 = vld [vmem:[%s3252_s0 + $0x2b0] sm:$0xff]  ;;  %v251_v7 = vld [vmem:[%s3252_s0 + $0xd8] sm:$0xff]  ;;  %v313_v8 = vld [vmem:[%s3252_s0 + $0x2c8] sm:$0xff]  ;;  %v1455_v10 = vpack.c.bf16 %v246_v2, %v244_v1 }
  0x12   :  { %1512 = vmatpush1.bf16.msra.mxu0 %v1511_v51  ;;  %1450 = vmatprep.subr.bf16.mxu1 %v1449_v52  ;;  %v315_v9 = vld [vmem:[%s3252_s0 + $0x2d8] sm:$0xff]  ;;  %v1519_v11 = vpack.c.bf16 %v310_v5, %v308_v3  ;;  %v1457_v12 = vpack.c.bf16 %v251_v7, %v249_v6  ;;  %v248_v13 = vld [vmem:[%s3252_s0 + $0xc0] sm:$0xff]  ;;  %v250_v14 = vld [vmem:[%s3252_s0 + $0xd0] sm:$0xff]  ;;  %v110_v6 = vlaneseq }
  0x13   :  { %1514 = vmatprep.subr.bf16.mxu0 %v1513_v56  ;;  %v312_v15 = vld [vmem:[%s3252_s0 + $0x2c0] sm:$0xff]  ;;  %v1521_v16 = vpack.c.bf16 %v315_v9, %v313_v8  ;;  %v314_v17 = vld [vmem:[%s3252_s0 + $0x2d0] sm:$0xff]  ;;  %v253_v18 = vld [vmem:[%s3252_s0 + $0xe8] sm:$0xff]  ;;  %v1459_v22 = vpack.c.bf16 %v250_v14, %v248_v13 }
  0x14   :  { %v255_v19 = vld [vmem:[%s3252_s0 + $0xf8] sm:$0xff]  ;;  %v317_v20 = vld [vmem:[%s3252_s0 + $0x2e8] sm:$0xff]  ;;  %v1523_v23 = vpack.c.bf16 %v314_v17, %v312_v15  ;;  %v252_v25 = vld [vmem:[%s3252_s0 + $0xe0] sm:$0xff] }
  0x15   :  { %1452 = vmatpush1.bf16.msra.mxu1 %v1451_v62  ;;  %v319_v21 = vld [vmem:[%s3252_s0 + $0x2f8] sm:$0xff]  ;;  %v1461_v24 = vpack.c.bf16 %v255_v19, %v253_v18  ;;  %v254_v26 = vld [vmem:[%s3252_s0 + $0xf0] sm:$0xff]  ;;  %v316_v27 = vld [vmem:[%s3252_s0 + $0x2e0] sm:$0xff] }
  0x16   :  { %1516 = vmatpush1.bf16.msra.mxu0 %v1515_v63  ;;  %1454 = vmatprep.subr.bf16.mxu1 %v1453_v0  ;;  %v1525_v28 = vpack.c.bf16 %v319_v21, %v317_v20  ;;  %v318_v29 = vld [vmem:[%s3252_s0 + $0x2f0] sm:$0xff]  ;;  %v257_v30 = vld [vmem:[%s3252_s0 + $0x108] sm:$0xff]  ;;  %v259_v31 = vld [vmem:[%s3252_s0 + $0x118] sm:$0xff]  ;;  %v1463_v34 = vpack.c.bf16 %v254_v26, %v252_v25  ;;  %v2042_v21 = vshrl.u32 %v110_v6, 7 }
  0x17   :  { %1518 = vmatprep.subr.bf16.mxu0 %v1517_v4  ;;  %v321_v32 = vld [vmem:[%s3252_s0 + $0x308] sm:$0xff]  ;;  %v323_v33 = vld [vmem:[%s3252_s0 + $0x318] sm:$0xff]  ;;  %v1527_v35 = vpack.c.bf16 %v318_v29, %v316_v27  ;;  %v1465_v36 = vpack.c.bf16 %v259_v31, %v257_v30  ;;  %v256_v37 = vld [vmem:[%s3252_s0 + $0x100] sm:$0xff] }
  0x18   :  { %v258_v38 = vld [vmem:[%s3252_s0 + $0x110] sm:$0xff]  ;;  %v320_v39 = vld [vmem:[%s3252_s0 + $0x300] sm:$0xff]  ;;  %v1529_v40 = vpack.c.bf16 %v323_v33, %v321_v32  ;;  %v261_v42 = vld [vmem:[%s3252_s0 + $0x128] sm:$0xff] }
  0x19   :  { %1456 = vmatpush1.bf16.msra.mxu1 %v1455_v10  ;;  %v322_v41 = vld [vmem:[%s3252_s0 + $0x310] sm:$0xff]  ;;  %v263_v43 = vld [vmem:[%s3252_s0 + $0x138] sm:$0xff]  ;;  %v325_v44 = vld [vmem:[%s3252_s0 + $0x328] sm:$0xff]  ;;  %v1467_v46 = vpack.c.bf16 %v258_v38, %v256_v37  ;;  %v124_v37 = vsub.s32 3, %v2042_v21 }
  0x1a   :  { %1520 = vmatpush1.bf16.msra.mxu0 %v1519_v11  ;;  %1458 = vmatprep.subr.bf16.mxu1 %v1457_v12  ;;  %v327_v45 = vld [vmem:[%s3252_s0 + $0x338] sm:$0xff]  ;;  %v1531_v47 = vpack.c.bf16 %v322_v41, %v320_v39  ;;  %v1469_v48 = vpack.c.bf16 %v263_v43, %v261_v42  ;;  %v260_v49 = vld [vmem:[%s3252_s0 + $0x120] sm:$0xff]  ;;  %v262_v50 = vld [vmem:[%s3252_s0 + $0x130] sm:$0xff]  ;;  %v132_v41 = vsub.s32 5, %v2042_v21  ;;  %v128_v42 = vsub.s32 4, %v2042_v21 }
  0x1b   :  { %1522 = vmatprep.subr.bf16.mxu0 %v1521_v16  ;;  %v324_v51 = vld [vmem:[%s3252_s0 + $0x320] sm:$0xff]  ;;  %v1533_v52 = vpack.c.bf16 %v327_v45, %v325_v44  ;;  %v326_v53 = vld [vmem:[%s3252_s0 + $0x330] sm:$0xff]  ;;  %v265_v54 = vld [vmem:[%s3252_s0 + $0x148] sm:$0xff]  ;;  %v1471_v58 = vpack.c.bf16 %v262_v50, %v260_v49 }
  0x1c   :  { %v267_v55 = vld [vmem:[%s3252_s0 + $0x158] sm:$0xff]  ;;  %v329_v56 = vld [vmem:[%s3252_s0 + $0x348] sm:$0xff]  ;;  %v1535_v59 = vpack.c.bf16 %v326_v53, %v324_v51  ;;  %v264_v61 = vld [vmem:[%s3252_s0 + $0x140] sm:$0xff] }
  0x1d   :  { %1460 = vmatpush1.bf16.msra.mxu1 %v1459_v22  ;;  %v331_v57 = vld [vmem:[%s3252_s0 + $0x358] sm:$0xff]  ;;  %v1473_v60 = vpack.c.bf16 %v267_v55, %v265_v54  ;;  %v266_v62 = vld [vmem:[%s3252_s0 + $0x150] sm:$0xff]  ;;  %v328_v63 = vld [vmem:[%s3252_s0 + $0x340] sm:$0xff] }
  0x1e   :  { %1524 = vmatpush1.bf16.msra.mxu0 %v1523_v23  ;;  %1462 = vmatprep.subr.bf16.mxu1 %v1461_v24  ;;  %v1537_v0 = vpack.c.bf16 %v331_v57, %v329_v56  ;;  %v330_v1 = vld [vmem:[%s3252_s0 + $0x350] sm:$0xff]  ;;  %v269_v2 = vld [vmem:[%s3252_s0 + $0x168] sm:$0xff]  ;;  %v271_v3 = vld [vmem:[%s3252_s0 + $0x178] sm:$0xff]  ;;  %v1475_v7 = vpack.c.bf16 %v266_v62, %v264_v61 }
  0x1f   :  { %1526 = vmatprep.subr.bf16.mxu0 %v1525_v28  ;;  %v333_v4 = vld [vmem:[%s3252_s0 + $0x368] sm:$0xff]  ;;  %v335_v5 = vld [vmem:[%s3252_s0 + $0x378] sm:$0xff]  ;;  %v268_v8 = vld [vmem:[%s3252_s0 + $0x160] sm:$0xff]  ;;  %v1539_v9 = vpack.c.bf16 %v330_v1, %v328_v63  ;;  %v1477_v10 = vpack.c.bf16 %v271_v3, %v269_v2 }
  0x20   :  { %v270_v11 = vld [vmem:[%s3252_s0 + $0x170] sm:$0xff]  ;;  %v332_v12 = vld [vmem:[%s3252_s0 + $0x360] sm:$0xff]  ;;  %v1541_v14 = vpack.c.bf16 %v335_v5, %v333_v4  ;;  %v273_v15 = vld [vmem:[%s3252_s0 + $0x188] sm:$0xff] }
  0x21   :  { %1464 = vmatpush1.bf16.msra.mxu1 %v1463_v34  ;;  %v334_v13 = vld [vmem:[%s3252_s0 + $0x370] sm:$0xff]  ;;  %v275_v16 = vld [vmem:[%s3252_s0 + $0x198] sm:$0xff]  ;;  %v20_v17 = vld [vmem:[%s3253_s1] sm:$0x3f]  ;;  %v1479_v22 = vpack.c.bf16 %v270_v11, %v268_v8  ;;  %v120_v11 = vsub.s32 2, %v2042_v21 }
  0x22   :  { %1528 = vmatpush1.bf16.msra.mxu0 %v1527_v35  ;;  %1466 = vmatprep.subr.bf16.mxu1 %v1465_v36  ;;  %v337_v18 = vld [vmem:[%s3252_s0 + $0x388] sm:$0xff]  ;;  %v339_v19 = vld [vmem:[%s3252_s0 + $0x398] sm:$0xff]  ;;  %v21_v20 = vmul.f32 0.16666667, %v20_v17  ;;  %v1543_v23 = vpack.c.bf16 %v334_v13, %v332_v12  ;;  %v1481_v24 = vpack.c.bf16 %v275_v16, %v273_v15  ;;  %v272_v25 = vld [vmem:[%s3252_s0 + $0x180] sm:$0xff]  ;;  %v116_v36 = vsub.s32 1, %v2042_v21 }
  0x23   :  { %1530 = vmatprep.subr.bf16.mxu0 %v1529_v40  ;;  %v274_v26 = vld [vmem:[%s3252_s0 + $0x190] sm:$0xff]  ;;  %v336_v27 = vld [vmem:[%s3252_s0 + $0x380] sm:$0xff]  ;;  %v1545_v29 = vpack.c.bf16 %v339_v19, %v337_v18  ;;  %v277_v31 = vld [vmem:[%s3252_s0 + $0x1a8] sm:$0xff] }
  0x24   :  { %v22_v28 = vadd.f32 0.5, %v21_v20  ;;  %v338_v30 = vld [vmem:[%s3252_s0 + $0x390] sm:$0xff]  ;;  %v279_v32 = vld [vmem:[%s3252_s0 + $0x1b8] sm:$0xff]  ;;  %v341_v33 = vld [vmem:[%s3252_s0 + $0x3a8] sm:$0xff]  ;;  %v1483_v38 = vpack.c.bf16 %v274_v26, %v272_v25 }
  0x25   :  { %1468 = vmatpush1.bf16.msra.mxu1 %v1467_v46  ;;  %v343_v34 = vld [vmem:[%s3252_s0 + $0x3b8] sm:$0xff]  ;;  %v276_v39 = vld [vmem:[%s3252_s0 + $0x1a0] sm:$0xff]  ;;  %v278_v40 = vld [vmem:[%s3252_s0 + $0x1b0] sm:$0xff]  ;;  %v1547_v43 = vpack.c.bf16 %v338_v30, %v336_v27  ;;  %v1485_v44 = vpack.c.bf16 %v279_v32, %v277_v31 }
  0x26   :  { %1532 = vmatpush1.bf16.msra.mxu0 %v1531_v47  ;;  %1470 = vmatprep.subr.bf16.mxu1 %v1469_v48  ;;  %v23_v35 = vmax.f32 %v22_v28, 0.0  ;;  %v340_v45 = vld [vmem:[%s3252_s0 + $0x3a0] sm:$0xff]  ;;  %v342_v46 = vld [vmem:[%s3252_s0 + $0x3b0] sm:$0xff]  ;;  %v281_v47 = vld [vmem:[%s3252_s0 + $0x1c8] sm:$0xff]  ;;  %v1549_v49 = vpack.c.bf16 %v343_v34, %v341_v33  ;;  %v1487_v57 = vpack.c.bf16 %v278_v40, %v276_v39 }
  0x27   :  { %1534 = vmatprep.subr.bf16.mxu0 %v1533_v52  ;;  %v283_v50 = vld [vmem:[%s3252_s0 + $0x1d8] sm:$0xff]  ;;  %v26_v51 = vld [vmem:[%s3254_s2 + $0x8] sm:$0xff]  ;;  %v280_v62 = vld [vmem:[%s3252_s0 + $0x1c0] sm:$0xff] }
  0x28   :  { %v24_v48 = vmin.f32 %v23_v35, 1.0  ;;  %v28_v52 = vld [vmem:[%s3254_s2 + $0x18] sm:$0xff]  ;;  %v345_v53 = vld [vmem:[%s3252_s0 + $0x3c8] sm:$0xff]  ;;  %v1489_v61 = vpack.c.bf16 %v283_v50, %v281_v47  ;;  %v282_v63 = vld [vmem:[%s3252_s0 + $0x1d0] sm:$0xff] }
  0x29   :  { %1472 = vmatpush1.bf16.msra.mxu1 %v1471_v58  ;;  %v347_v54 = vld [vmem:[%s3252_s0 + $0x3d8] sm:$0xff]  ;;  %v1551_v58 = vpack.c.bf16 %v342_v46, %v340_v45  ;;  %v346_v4 = vld [vmem:[%s3252_s0 + $0x3d0] sm:$0xff]  ;;  %v285_v5 = vld [vmem:[%s3252_s0 + $0x1e8] sm:$0xff] }
  0x2a   :  { %1536 = vmatpush1.bf16.msra.mxu0 %v1535_v59  ;;  %1474 = vmatprep.subr.bf16.mxu1 %v1473_v60  ;;  %v2102_v55 = vrot.slane %v24_v48, %v116_v36  ;;  %v2104_v56 = vrot.slane %v24_v48, %v124_v37  ;;  %v2106_v59 = vrot.slane %v24_v48, %v132_v41  ;;  %v287_v6 = vld [vmem:[%s3252_s0 + $0x1f8] sm:$0xff]  ;;  %v286_v15 = vld [vmem:[%s3252_s0 + $0x1f0] sm:$0xff]  ;;  %v348_v16 = vld [vmem:[%s3252_s0 + $0x3e0] sm:$0xff] }
  0x2b   :  { %1538 = vmatprep.subr.bf16.mxu0 %v1537_v0  ;;  %v2108_v60 = vrot.slane %v24_v48, %v128_v42  ;;  %v344_v0 = vld [vmem:[%s3252_s0 + $0x3c0] sm:$0xff]  ;;  %v1553_v3 = vpack.c.bf16 %v347_v54, %v345_v53  ;;  %v351_v8 = vld [vmem:[%s3252_s0 + $0x3f8] sm:$0xff]  ;;  %v1493_v13 = vpack.c.bf16 %v287_v6, %v285_v5  ;;  %v350_v18 = vld [vmem:[%s3252_s0 + $0x3f0] sm:$0xff]  ;;  %v2164_v25 = vrot.slane %v24_v48, %v120_v11 }
  0x2c   :  { %v141_v1 = vmul.f32 %v2102_v55, %v26_v51  ;;  %v143_v2 = vmul.f32 %v2104_v56, %v28_v52  ;;  %v1555_v12 = vpack.c.bf16 %v346_v4, %v344_v0  ;;  %v353_v19 = vld [vmem:[%s3252_s0 + $0x408] sm:$0xff]  ;;  %v355_v20 = vld [vmem:[%s3252_s0 + $0x418] sm:$0xff]  ;;  %v352_v26 = vld [vmem:[%s3252_s0 + $0x400] sm:$0xff]  ;;  %v1559_v27 = vpack.c.bf16 %v350_v18, %v348_v16 }
  0x2d   :  { %1476 = vmatpush1.bf16.msra.mxu1 %v1475_v7  ;;  %v349_v7 = vld [vmem:[%s3252_s0 + $0x3e8] sm:$0xff]  ;;  %v1561_v28 = vpack.c.bf16 %v355_v20, %v353_v19  ;;  %v32_v30 = vld [vmem:[%s3254_s2 + $0x38] sm:$0xff]  ;;  %v31_v32 = vld [vmem:[%s3254_s2 + $0x30] sm:$0xff] }
  0x2e   :  { %1540 = vmatpush1.bf16.msra.mxu0 %v1539_v9  ;;  %1478 = vmatprep.subr.bf16.mxu1 %v1477_v10  ;;  %v112_v9 = vsub.s32 0, %v2042_v21  ;;  %v1491_v10 = vpack.c.bf16 %v282_v63, %v280_v62  ;;  %v1557_v17 = vpack.c.bf16 %v351_v8, %v349_v7  ;;  %v34_v31 = vld [vmem:[%s3254_s2 + $0x48] sm:$0xff]  ;;  %v359_v34 = vld [vmem:[%s3252_s0 + $0x438] sm:$0xff]  ;;  %v33_v36 = vld [vmem:[%s3254_s2 + $0x40] sm:$0xff]  ;;  %v147_v42 = vmul.f32 %v2102_v55, %v32_v30 }
  0x2f   :  { %1542 = vmatprep.subr.bf16.mxu0 %v1541_v14  ;;  %499 = vmatprep.mubr.f32.mxu1 %v141_v1  ;;  %v284_v14 = vld [vmem:[%s3252_s0 + $0x1e0] sm:$0xff]  ;;  %v357_v33 = vld [vmem:[%s3252_s0 + $0x428] sm:$0xff]  ;;  %v358_v40 = vld [vmem:[%s3252_s0 + $0x430] sm:$0xff] }
  0x30   :  { %648 = vmatprep.mubr.f32.mxu0 %v143_v2  ;;  %v2156_v21 = vrot.slane %v24_v48, %v112_v9  ;;  %v38_v37 = vld [vmem:[%s3254_s2 + $0x68] sm:$0xff]  ;;  %v356_v39 = vld [vmem:[%s3252_s0 + $0x420] sm:$0xff]  ;;  %v44_v45 = vld [vmem:[%s3254_s2 + $0x98] sm:$0xff]  ;;  %v1565_v53 = vpack.c.bf16 %v359_v34, %v357_v33 }
  0x31   :  { %1480 = vmatpush1.bf16.msra.mxu1 %v1479_v22  ;;  %v1495_v22 = vpack.c.bf16 %v286_v15, %v284_v14  ;;  %v361_v46 = vld [vmem:[%s3252_s0 + $0x448] sm:$0xff]  ;;  %v363_v47 = vld [vmem:[%s3252_s0 + $0x458] sm:$0xff]  ;;  %v43_v51 = vld [vmem:[%s3254_s2 + $0x90] sm:$0xff]  ;;  %v1567_v62 = vpack.c.bf16 %v358_v40, %v356_v39  ;;  %v153_v4 = vmul.f32 %v2102_v55, %v38_v37  ;;  %v159_v11 = vmul.f32 %v2102_v55, %v44_v45 }
  0x32   :  { %1544 = vmatpush1.bf16.msra.mxu0 %v1543_v23  ;;  %1482 = vmatprep.subr.bf16.mxu1 %v1481_v24  ;;  %v25_v23 = vld [vmem:[%s3254_s2] sm:$0xff]  ;;  %v27_v24 = vld [vmem:[%s3254_s2 + $0x10] sm:$0xff]  ;;  %v46_v50 = vld [vmem:[%s3254_s2 + $0xa8] sm:$0xff]  ;;  %v1569_v63 = vpack.c.bf16 %v363_v47, %v361_v46  ;;  %v158_v16 = vmul.f32 %v2156_v21, %v43_v51 }
  0x33   :  { %1546 = vmatprep.subr.bf16.mxu0 %v1545_v29  ;;  %v354_v29 = vld [vmem:[%s3252_s0 + $0x410] sm:$0xff]  ;;  %v140_v35 = vmul.f32 %v2156_v21, %v25_v23  ;;  %v142_v41 = vmul.f32 %v2164_v25, %v27_v24  ;;  %v45_v52 = vld [vmem:[%s3254_s2 + $0xa0] sm:$0xff]  ;;  %v52_v0 = vld [vmem:[%s3254_s2 + $0xd8] sm:$0xff]  ;;  %v161_v15 = vmul.f32 %v2104_v56, %v46_v50 }
  0x34   :  { %v1563_v48 = vpack.c.bf16 %v354_v29, %v352_v26  ;;  %v360_v54 = vld [vmem:[%s3252_s0 + $0x440] sm:$0xff]  ;;  %v51_v2 = vld [vmem:[%s3254_s2 + $0xd0] sm:$0xff]  ;;  %v365_v6 = vld [vmem:[%s3252_s0 + $0x468] sm:$0xff]  ;;  %v2291_v24 = vmul.f32 %v2104_v56, %v52_v0 }
  0x35   :  { %1484 = vmatpush1.bf16.msra.mxu1 %v1483_v38  ;;  %v40_v38 = vld [vmem:[%s3254_s2 + $0x78] sm:$0xff]  ;;  %v49_v1 = vld [vmem:[%s3254_s2 + $0xc0] sm:$0xff]  ;;  %v58_v14 = vld [vmem:[%s3254_s2 + $0x108] sm:$0xff]  ;;  %v2306_v30 = vmul.f32 %v2164_v25, %v51_v2 }
  0x36   :  { %1548 = vmatpush1.bf16.msra.mxu0 %v1547_v43  ;;  %1486 = vmatprep.subr.bf16.mxu1 %v1485_v44  ;;  %v37_v43 = vld [vmem:[%s3254_s2 + $0x60] sm:$0xff]  ;;  %v39_v44 = vld [vmem:[%s3254_s2 + $0x70] sm:$0xff]  ;;  %v155_v5 = vmul.f32 %v2104_v56, %v40_v38  ;;  %v367_v7 = vld [vmem:[%s3252_s0 + $0x478] sm:$0xff]  ;;  %v2303_v29 = vmul.f32 %v2156_v21, %v49_v1  ;;  %v2323_v37 = vmul.f32 %v2104_v56, %v58_v14 }
  0x37   :  { %1550 = vmatprep.subr.bf16.mxu0 %v1549_v49  ;;  %v149_v49 = vmul.f32 %v2104_v56, %v34_v31  ;;  %v364_v8 = vld [vmem:[%s3252_s0 + $0x460] sm:$0xff]  ;;  %v152_v9 = vmul.f32 %v2156_v21, %v37_v43  ;;  %v55_v18 = vld [vmem:[%s3254_s2 + $0xf0] sm:$0xff]  ;;  %v62_v20 = vld [vmem:[%s3254_s2 + $0x128] sm:$0xff]  ;;  %v1573_v31 = vpack.c.bf16 %v367_v7, %v365_v6 }
  0x38   :  { %v57_v19 = vld [vmem:[%s3254_s2 + $0x100] sm:$0xff]  ;;  %v369_v26 = vld [vmem:[%s3252_s0 + $0x488] sm:$0xff]  ;;  %v375_v34 = vld [vmem:[%s3252_s0 + $0x4b8] sm:$0xff]  ;;  %v2326_v38 = vmul.f32 %v2156_v21, %v55_v18  ;;  %v2332_v40 = vmul.f32 %v2102_v55, %v62_v20 }
  0x39   :  { %1488 = vmatpush1.bf16.msra.mxu1 %v1487_v57  ;;  %v362_v57 = vld [vmem:[%s3252_s0 + $0x450] sm:$0xff]  ;;  %v373_v33 = vld [vmem:[%s3252_s0 + $0x4a8] sm:$0xff]  ;;  %v2329_v39 = vmul.f32 %v2164_v25, %v57_v19  ;;  %v72_v45 = vld [vmem:[%s3254_s2 + $0x178] sm:$0xff] }
  0x3a   :  { %1552 = vmatpush1.bf16.msra.mxu0 %v1551_v58  ;;  %1490 = vmatprep.subr.bf16.mxu1 %v1489_v61  ;;  %v50_v58 = vld [vmem:[%s3254_s2 + $0xc8] sm:$0xff]  ;;  %v146_v61 = vmul.f32 %v2156_v21, %v31_v32  ;;  %v370_v32 = vld [vmem:[%s3252_s0 + $0x490] sm:$0xff]  ;;  %v2338_v43 = vpack.c.bf16 %v375_v34, %v373_v33  ;;  %v29_v46 = vld [vmem:[%s3254_s2 + $0x20] sm:$0xff] }
  0x3b   :  { %1554 = vmatprep.subr.bf16.mxu0 %v1553_v3  ;;  %v148_v3 = vmul.f32 %v2164_v25, %v33_v36  ;;  %v2288_v23 = vmul.f32 %v2102_v55, %v50_v58  ;;  %v71_v50 = vld [vmem:[%s3254_s2 + $0x170] sm:$0xff]  ;;  %v36_v51 = vld [vmem:[%s3254_s2 + $0x58] sm:$0xff]  ;;  %v54_v18 = vld [vmem:[%s3254_s2 + $0xe8] sm:$0xff] }
  0x3c   :  { %v35_v58 = vld [vmem:[%s3254_s2 + $0x50] sm:$0xff]  ;;  %v84_v2 = vld [vmem:[%s3254_s2 + $0x1d8] sm:$0xff]  ;;  %v377_v20 = vld [vmem:[%s3252_s0 + $0x4c8] sm:$0xff] }
  0x3d   :  { %1492 = vmatpush1.bf16.msra.mxu1 %v1491_v10  ;;  %v154_v10 = vmul.f32 %v2164_v25, %v39_v44  ;;  %v30_v44 = vld [vmem:[%s3254_s2 + $0x28] sm:$0xff]  ;;  %v96_v19 = vld [vmem:[%s3254_s2 + $0x238] sm:$0xff] }
  0x3e   :  { %1556 = vmatpush1.bf16.msra.mxu0 %v1555_v12  ;;  %1494 = vmatprep.subr.bf16.mxu1 %v1493_v13  ;;  %v366_v12 = vld [vmem:[%s3252_s0 + $0x470] sm:$0xff]  ;;  %v56_v13 = vld [vmem:[%s3254_s2 + $0xf8] sm:$0xff]  ;;  %v2350_v47 = vmul.f32 %v2106_v59, %v30_v44  ;;  %v102_v44 = vld [vmem:[%s3254_s2 + $0x268] sm:$0xff] }
  0x3f   :  { %1558 = vmatprep.subr.bf16.mxu0 %v1557_v17  ;;  %v2276_v17 = vmul.f32 %v2164_v25, %v45_v52  ;;  %v2320_v36 = vmul.f32 %v2102_v55, %v56_v13  ;;  %v78_v52 = vld [vmem:[%s3254_s2 + $0x1a8] sm:$0xff]  ;;  %v374_v13 = vld [vmem:[%s3252_s0 + $0x4b0] sm:$0xff] }
  0x41   :  { %1496 = vmatpush1.bf16.msra.mxu1 %v1495_v22  ;;  %v1571_v22 = vpack.c.bf16 %v362_v57, %v360_v54  ;;  %v2371_v54 = vmul.f32 %v2106_v59, %v36_v51  ;;  %v2374_v57 = vmul.f32 %v2106_v59, %v78_v52  ;;  %v66_v52 = vld [vmem:[%s3254_s2 + $0x148] sm:$0xff] }
  0x42   :  { %1560 = vmatpush1.bf16.msra.mxu0 %v1559_v27  ;;  %1601 = vmatprep.subr.bf16.mxu1 %v1561_v28  ;;  %v371_v27 = vld [vmem:[%s3252_s0 + $0x498] sm:$0xff] }
  0x43   :  { %1562 = vmatprep.subr.bf16.mxu0 %v1561_v28  ;;  %v368_v28 = vld [vmem:[%s3252_s0 + $0x480] sm:$0xff] }
  0x44   :  { %500 = vmatmul.mubr.f32.vlgmr.msra.gmra.mrb[0].mxu1 %v140_v35  ;;  %v2317_v35 = vpack.c.bf16 %v366_v12, %v364_v8  ;;  %v48_v8 = vld [vmem:[%s3254_s2 + $0xb8] sm:$0xff]  ;;  %v372_v12 = vld [vmem:[%s3252_s0 + $0x4a0] sm:$0xff] }
  0x45   :  { %649 = vmatmul.mubr.f32.vlgmr.msra.gmra.mrb[0].mxu0 %v142_v41  ;;  %505 = vmatprep.mubr.f32.mxu1 %v147_v42  ;;  %v2334_v41 = vpack.c.bf16 %v371_v27, %v369_v26  ;;  %v2336_v42 = vpack.c.bf16 %v370_v32, %v368_v28  ;;  %v2433_v14 = vmul.f32 %v2106_v59, %v48_v8  ;;  %v95_v28 = vld [vmem:[%s3254_s2 + $0x230] sm:$0xff] }
  0x46   :  { %1564 = vmatpush1.bf16.msra.mxu0 %v1563_v48  ;;  %654 = vmatprep.mubr.f32.mxu0 %v149_v49  ;;  %v2356_v49 = vmul.f32 %v2108_v60, %v29_v46  ;;  %v2462_v26 = vmul.f32 %v2106_v59, %v54_v18  ;;  %v2465_v27 = vmul.f32 %v2106_v59, %v96_v19  ;;  %v69_v18 = vld [vmem:[%s3254_s2 + $0x160] sm:$0xff]  ;;  %v76_v19 = vld [vmem:[%s3254_s2 + $0x198] sm:$0xff] }
  0x47   :  { %1611 = vmatpush1.bf16.msra.mxu1 %v1563_v48  ;;  %1566 = vmatprep.subr.bf16.mxu0 %v1565_v53  ;;  %v2353_v48 = vmul.f32 %v2106_v59, %v72_v45  ;;  %v2482_v33 = vmul.f32 %v2108_v60, %v95_v28  ;;  %v59_v45 = vld [vmem:[%s3254_s2 + $0x110] sm:$0xff]  ;;  %v2499_v46 = vmul.f32 %v2106_v59, %v102_v44  ;;  %v387_v44 = vld [vmem:[%s3252_s0 + $0x518] sm:$0xff] }
  0x48   :  { %506 = vmatmul.mubr.f32.gmra.mrb[2].mxu1 %v146_v61  ;;  %1602 = vmatprep.subr.bf16.mxu1 %v1565_v53  ;;  %v2368_v53 = vmul.f32 %v2108_v60, %v71_v50  ;;  %v77_v61 = vld [vmem:[%s3254_s2 + $0x1a0] sm:$0xff]  ;;  %v2502_v50 = vmul.f32 %v2108_v60, %v59_v45  ;;  %v184_v45 = vmul.f32 %v2164_v25, %v69_v18 }
  0x49   :  { %655 = vmatmul.mubr.f32.gmra.mrb[2].mxu0 %v148_v3  ;;  %511 = vmatprep.mubr.f32.mxu1 %v153_v4  ;;  %v2389_v0 = vmul.f32 %v2108_v60, %v77_v61  ;;  %v41_v3 = vld [vmem:[%s3254_s2 + $0x80] sm:$0xff]  ;;  %v83_v4 = vld [vmem:[%s3254_s2 + $0x1d0] sm:$0xff]  ;;  %v2522_v61 = vmul.f32 %v2106_v59, %v66_v52 }
  0x4a   :  { %660 = vmatprep.mubr.f32.mxu0 %v155_v5  ;;  %1568 = vmatpush1.bf16.msra.mxu0 %v1567_v62  ;;  %v2404_v5 = vmul.f32 %v2106_v59, %v84_v2  ;;  %v2407_v6 = vmul.f32 %v2108_v60, %v41_v3  ;;  %v2410_v7 = vmul.f32 %v2108_v60, %v83_v4  ;;  %v107_v3 = vld [vmem:[%s3254_s2 + $0x290] sm:$0xff]  ;;  %v73_v52 = vld [vmem:[%s3254_s2 + $0x180] sm:$0xff] }
  0x4b   :  { %1612 = vmatpush1.bf16.msra.mxu1 %v1567_v62  ;;  %1570 = vmatprep.subr.bf16.mxu0 %v1569_v63  ;;  %v42_v62 = vld [vmem:[%s3254_s2 + $0x88] sm:$0xff]  ;;  %v1583_v4 = vpack.c.bf16 %v374_v13, %v372_v12  ;;  %v2543_v8 = vmul.f32 %v2108_v60, %v107_v3  ;;  %v383_v12 = vld [vmem:[%s3252_s0 + $0x4f8] sm:$0xff] }
  0x4c   :  { %512 = vmatmul.mubr.f32.gmra.mrb[4].mxu1 %v152_v9  ;;  %1603 = vmatprep.subr.bf16.mxu1 %v1569_v63  ;;  %v2386_v63 = vmul.f32 %v2108_v60, %v35_v58  ;;  %v2392_v1 = vmul.f32 %v2106_v59, %v42_v62  ;;  %v90_v9 = vld [vmem:[%s3254_s2 + $0x208] sm:$0xff]  ;;  %v108_v58 = vld [vmem:[%s3254_s2 + $0x298] sm:$0xff] }
  0x4d   :  { %661 = vmatmul.mubr.f32.gmra.mrb[4].mxu0 %v154_v10  ;;  %517 = vmatprep.mubr.f32.mxu1 %v159_v11  ;;  %v47_v10 = vld [vmem:[%s3254_s2 + $0xb0] sm:$0xff]  ;;  %v64_v11 = vld [vmem:[%s3254_s2 + $0x138] sm:$0xff]  ;;  %v2525_v62 = vmul.f32 %v2106_v59, %v108_v58  ;;  %v191_v58 = vmul.f32 %v2104_v56, %v76_v19 }
  0x4e   :  { %666 = vmatprep.mubr.f32.mxu0 %v161_v15  ;;  %1572 = vmatpush1.bf16.msra.mxu0 %v1571_v22  ;;  %v2436_v15 = vmul.f32 %v2106_v59, %v90_v9 }
  0x4f   :  { %1613 = vmatpush1.bf16.msra.mxu1 %v1571_v22  ;;  %1574 = vmatprep.subr.bf16.mxu0 %v1573_v31  ;;  %v379_v22 = vld [vmem:[%s3252_s0 + $0x4d8] sm:$0xff] }
  0x50   :  { %518 = vmatmul.mubr.f32.gmra.mrb[6].mxu1 %v158_v16  ;;  %1604 = vmatprep.subr.bf16.mxu1 %v1573_v31  ;;  %v2439_v16 = vmul.f32 %v2108_v60, %v47_v10  ;;  %v60_v31 = vld [vmem:[%s3254_s2 + $0x118] sm:$0xff]  ;;  %v1585_v9 = vpack.c.bf16 %v379_v22, %v377_v20  ;;  %v376_v10 = vld [vmem:[%s3252_s0 + $0x4c0] sm:$0xff] }
  0x51   :  { %667 = vmatmul.mubr.f32.gmra.mrb[6].mxu0 %v2276_v17  ;;  %523 = vmatprep.mubr.f32.mxu1 %v2288_v23  ;;  %v89_v17 = vld [vmem:[%s3254_s2 + $0x200] sm:$0xff]  ;;  %v2485_v34 = vmul.f32 %v2106_v59, %v60_v31  ;;  %v68_v59 = vld [vmem:[%s3254_s2 + $0x158] sm:$0xff]  ;;  %v385_v31 = vld [vmem:[%s3252_s0 + $0x508] sm:$0xff] }
  0x52   :  { %672 = vmatprep.mubr.f32.mxu0 %v2291_v24  ;;  %1576 = vmatpush1.bf16.msra.mxu0 %v2317_v35  ;;  %v2459_v23 = vmul.f32 %v2108_v60, %v89_v17  ;;  %v53_v24 = vld [vmem:[%s3254_s2 + $0xe0] sm:$0xff] }
  0x53   :  { %1614 = vmatpush1.bf16.msra.mxu1 %v2317_v35  ;;  %1578 = vmatprep.subr.bf16.mxu0 %v2334_v41  ;;  %v2479_v32 = vmul.f32 %v2108_v60, %v53_v24  ;;  %v101_v35 = vld [vmem:[%s3254_s2 + $0x260] sm:$0xff]  ;;  %v382_v24 = vld [vmem:[%s3252_s0 + $0x4f0] sm:$0xff] }
  0x54   :  { %524 = vmatmul.mubr.f32.gmra.mrb[8].mxu1 %v2303_v29  ;;  %1605 = vmatprep.subr.bf16.mxu1 %v2334_v41  ;;  %v2505_v51 = vmul.f32 %v2108_v60, %v101_v35  ;;  %v65_v29 = vld [vmem:[%s3254_s2 + $0x140] sm:$0xff] }
  0x55   :  { %673 = vmatmul.mubr.f32.gmra.mrb[8].mxu0 %v2306_v30  ;;  %529 = vmatprep.mubr.f32.mxu1 %v2320_v36  ;;  %v61_v41 = vld [vmem:[%s3254_s2 + $0x120] sm:$0xff]  ;;  %v2528_v2 = vmul.f32 %v2108_v60, %v65_v29  ;;  %v179_v30 = vmul.f32 %v2104_v56, %v64_v11  ;;  %v63_v36 = vld [vmem:[%s3254_s2 + $0x130] sm:$0xff] }
  0x56   :  { %678 = vmatprep.mubr.f32.mxu0 %v2323_v37  ;;  %1580 = vmatpush1.bf16.msra.mxu0 %v2336_v42  ;;  %v70_v37 = vld [vmem:[%s3254_s2 + $0x168] sm:$0xff]  ;;  %v378_v11 = vld [vmem:[%s3252_s0 + $0x4d0] sm:$0xff]  ;;  %v176_v60 = vmul.f32 %v2156_v21, %v61_v41  ;;  %v178_v13 = vmul.f32 %v2164_v25, %v63_v36  ;;  %v380_v22 = vld [vmem:[%s3252_s0 + $0x4e0] sm:$0xff]  ;;  %v1593_v36 = vpack.c.bf16 %v387_v44, %v385_v31 }
  0x57   :  { %1615 = vmatpush1.bf16.msra.mxu1 %v2336_v42  ;;  %1582 = vmatprep.subr.bf16.mxu0 %v2338_v43  ;;  %v381_v42 = vld [vmem:[%s3252_s0 + $0x4e8] sm:$0xff]  ;;  %v185_v17 = vmul.f32 %v2104_v56, %v70_v37  ;;  %v75_v29 = vld [vmem:[%s3254_s2 + $0x190] sm:$0xff]  ;;  %v80_v41 = vld [vmem:[%s3254_s2 + $0x1b8] sm:$0xff]  ;;  %v1591_v3 = vpack.c.bf16 %v382_v24, %v380_v22  ;;  %v188_v37 = vmul.f32 %v2156_v21, %v73_v52 }
  0x58   :  { %530 = vmatmul.mubr.f32.gmra.mrb[10].mxu1 %v2326_v38  ;;  %1606 = vmatprep.subr.bf16.mxu1 %v2338_v43  ;;  %v183_v38 = vmul.f32 %v2102_v55, %v68_v59  ;;  %v67_v43 = vld [vmem:[%s3254_s2 + $0x150] sm:$0xff]  ;;  %v1589_v20 = vpack.c.bf16 %v383_v12, %v381_v42  ;;  %v384_v59 = vld [vmem:[%s3252_s0 + $0x500] sm:$0xff]  ;;  %v92_v44 = vld [vmem:[%s3254_s2 + $0x218] sm:$0xff] }
  0x59   :  { %679 = vmatmul.mubr.f32.gmra.mrb[10].mxu0 %v2329_v39  ;;  %535 = vmatprep.mubr.f32.mxu1 %v2332_v40  ;;  %v74_v39 = vld [vmem:[%s3254_s2 + $0x188] sm:$0xff]  ;;  %v1587_v40 = vpack.c.bf16 %v378_v11, %v376_v10  ;;  %v182_v28 = vmul.f32 %v2156_v21, %v67_v43  ;;  %v391_v10 = vld [vmem:[%s3252_s0 + $0x538] sm:$0xff]  ;;  %v190_v11 = vmul.f32 %v2164_v25, %v75_v29  ;;  %v79_v42 = vld [vmem:[%s3254_s2 + $0x1b0] sm:$0xff] }
  0x5a   :  { %684 = vmatprep.mubr.f32.mxu0 %v179_v30  ;;  %1584 = vmatpush1.bf16.msra.mxu0 %v1583_v4  ;;  %v189_v35 = vmul.f32 %v2102_v55, %v74_v39  ;;  %v82_v30 = vld [vmem:[%s3254_s2 + $0x1c8] sm:$0xff]  ;;  %v388_v39 = vld [vmem:[%s3252_s0 + $0x520] sm:$0xff]  ;;  %v194_v19 = vmul.f32 %v2156_v21, %v79_v42  ;;  %v87_v31 = vld [vmem:[%s3254_s2 + $0x1f0] sm:$0xff]  ;;  %v207_v29 = vmul.f32 %v2102_v55, %v92_v44 }
  0x5b   :  { %1616 = vmatpush1.bf16.msra.mxu1 %v1583_v4  ;;  %1586 = vmatprep.subr.bf16.mxu0 %v1585_v9  ;;  %v386_v4 = vld [vmem:[%s3252_s0 + $0x510] sm:$0xff]  ;;  %v197_v12 = vmul.f32 %v2104_v56, %v82_v30  ;;  %v85_v24 = vld [vmem:[%s3254_s2 + $0x1e0] sm:$0xff]  ;;  %v104_v42 = vld [vmem:[%s3254_s2 + $0x278] sm:$0xff] }
  0x5c   :  { %536 = vmatmul.mubr.f32.gmra.mrb[12].mxu1 %v176_v60  ;;  %1607 = vmatprep.subr.bf16.mxu1 %v1585_v9  ;;  %v389_v9 = vld [vmem:[%s3252_s0 + $0x528] sm:$0xff]  ;;  %v195_v60 = vmul.f32 %v2102_v55, %v80_v41  ;;  %v1595_v43 = vpack.c.bf16 %v386_v4, %v384_v59  ;;  %v200_v52 = vmul.f32 %v2156_v21, %v85_v24  ;;  %v91_v41 = vld [vmem:[%s3254_s2 + $0x210] sm:$0xff]  ;;  %v93_v30 = vld [vmem:[%s3254_s2 + $0x220] sm:$0xff] }
  0x5d   :  { %685 = vmatmul.mubr.f32.gmra.mrb[12].mxu0 %v178_v13  ;;  %541 = vmatprep.mubr.f32.mxu1 %v183_v38  ;;  %v81_v13 = vld [vmem:[%s3254_s2 + $0x1c0] sm:$0xff]  ;;  %v86_v38 = vld [vmem:[%s3254_s2 + $0x1e8] sm:$0xff]  ;;  %v1597_v18 = vpack.c.bf16 %v391_v10, %v389_v9  ;;  %v100_v59 = vld [vmem:[%s3254_s2 + $0x258] sm:$0xff]  ;;  %v206_v4 = vmul.f32 %v2156_v21, %v91_v41 }
  0x5e   :  { %690 = vmatprep.mubr.f32.mxu0 %v185_v17  ;;  %1588 = vmatpush1.bf16.msra.mxu0 %v1587_v40  ;;  %v88_v17 = vld [vmem:[%s3254_s2 + $0x1f8] sm:$0xff]  ;;  %v201_v22 = vmul.f32 %v2102_v55, %v86_v38  ;;  %v97_v10 = vld [vmem:[%s3254_s2 + $0x240] sm:$0xff] }
  0x5f   :  { %1617 = vmatpush1.bf16.msra.mxu1 %v1587_v40  ;;  %1590 = vmatprep.subr.bf16.mxu0 %v1589_v20  ;;  %v390_v40 = vld [vmem:[%s3252_s0 + $0x530] sm:$0xff] }
  0x60   :  { %542 = vmatmul.mubr.f32.gmra.mrb[14].mxu1 %v182_v28  ;;  %1608 = vmatprep.subr.bf16.mxu1 %v1589_v20  ;;  %v196_v20 = vmul.f32 %v2164_v25, %v81_v13  ;;  %v203_v28 = vmul.f32 %v2104_v56, %v88_v17  ;;  %v212_v13 = vmul.f32 %v2156_v21, %v97_v10  ;;  %v103_v17 = vld [vmem:[%s3254_s2 + $0x270] sm:$0xff] }
  0x61   :  { %691 = vmatmul.mubr.f32.gmra.mrb[14].mxu0 %v184_v45  ;;  %547 = vmatprep.mubr.f32.mxu1 %v189_v35  ;;  %v1599_v45 = vpack.c.bf16 %v390_v40, %v388_v39  ;;  %v94_v35 = vld [vmem:[%s3254_s2 + $0x228] sm:$0xff]  ;;  %v105_v39 = vld [vmem:[%s3254_s2 + $0x280] sm:$0xff]  ;;  %v218_v40 = vmul.f32 %v2156_v21, %v103_v17 }
  0x62   :  { %696 = vmatprep.mubr.f32.mxu0 %v191_v58  ;;  %1592 = vmatpush1.bf16.msra.mxu0 %v1591_v3  ;;  %v202_v58 = vmul.f32 %v2164_v25, %v87_v31 }
  0x63   :  { %1618 = vmatpush1.bf16.msra.mxu1 %v1591_v3  ;;  %1594 = vmatprep.subr.bf16.mxu0 %v1593_v36  ;;  %v209_v3 = vmul.f32 %v2104_v56, %v94_v35 }
  0x64   :  { %548 = vmatmul.mubr.f32.gmra.mrb[16].mxu1 %v188_v37  ;;  %1609 = vmatprep.subr.bf16.mxu1 %v1593_v36  ;;  %v98_v36 = vld [vmem:[%s3254_s2 + $0x248] sm:$0xff]  ;;  %v208_v37 = vmul.f32 %v2164_v25, %v93_v30 }
  0x65   :  { %697 = vmatmul.mubr.f32.gmra.mrb[16].mxu0 %v190_v11  ;;  %553 = vmatprep.mubr.f32.mxu1 %v195_v60  ;;  %v213_v9 = vmul.f32 %v2102_v55, %v98_v36  ;;  %v215_v11 = vmul.f32 %v2104_v56, %v100_v59  ;;  %v99_v60 = vld [vmem:[%s3254_s2 + $0x250] sm:$0xff] }
  0x66   :  { %702 = vmatprep.mubr.f32.mxu0 %v197_v12  ;;  %1596 = vmatpush1.bf16.msra.mxu0 %v1595_v43  ;;  %v106_v12 = vld [vmem:[%s3254_s2 + $0x288] sm:$0xff]  ;;  %v214_v38 = vmul.f32 %v2164_v25, %v99_v60 }
  0x67   :  { %1619 = vmatpush1.bf16.msra.mxu1 %v1595_v43  ;;  %1598 = vmatprep.subr.bf16.mxu0 %v1597_v18  ;;  %v219_v43 = vmul.f32 %v2102_v55, %v104_v42 }
  0x68   :  { %554 = vmatmul.mubr.f32.gmra.mrb[18].mxu1 %v194_v19  ;;  %1610 = vmatprep.subr.bf16.mxu1 %v1597_v18  ;;  %v221_v18 = vmul.f32 %v2104_v56, %v106_v12  ;;  %v220_v19 = vmul.f32 %v2164_v25, %v105_v39 }
  0x69   :  { %703 = vmatmul.mubr.f32.gmra.mrb[18].mxu0 %v196_v20  ;;  %559 = vmatprep.mubr.f32.mxu1 %v201_v22 }
  0x6a   :  { %708 = vmatprep.mubr.f32.mxu0 %v203_v28  ;;  %1600 = vmatpush1.bf16.msra.mxu0 %v1599_v45 }
  0x6b   :  { %1620 = vmatpush1.bf16.msra.mxu1 %v1599_v45 }
  0x6c   :  { %560 = vmatmul.mubr.f32.gmra.mrb[20].mxu1 %v200_v52 }
  0x6d   :  { %709 = vmatmul.mubr.f32.gmra.mrb[20].mxu0 %v202_v58  ;;  %565 = vmatprep.mubr.f32.mxu1 %v207_v29 }
  0x6e   :  { %714 = vmatprep.mubr.f32.mxu0 %v209_v3 }
  0x70   :  { %566 = vmatmul.mubr.f32.gmra.mrb[22].mxu1 %v206_v4 }
  0x71   :  { %715 = vmatmul.mubr.f32.gmra.mrb[22].mxu0 %v208_v37  ;;  %571 = vmatprep.mubr.f32.mxu1 %v213_v9 }
  0x72   :  { %720 = vmatprep.mubr.f32.mxu0 %v215_v11 }
  0x74   :  { %572 = vmatmul.mubr.f32.gmra.mrb[24].mxu1 %v212_v13 }
  0x75   :  { %721 = vmatmul.mubr.f32.gmra.mrb[24].mxu0 %v214_v38  ;;  %577 = vmatprep.mubr.f32.mxu1 %v219_v43 }
  0x76   :  { %726 = vmatprep.mubr.f32.mxu0 %v221_v18 }
  0x78   :  { %578 = vmatmul.mubr.f32.gmra.mrb[26].mxu1 %v218_v40 }
  0x79   :  { %727 = vmatmul.mubr.f32.gmra.mrb[26].mxu0 %v220_v19  ;;  %1426 = vmatprep.mubr.msk.f32.mxu1 %vm392_vm0, %v2353_v48 }
  0x7a   :  { %1419 = vmatprep.mubr.msk.f32.mxu0 %vm392_vm0, %v2350_v47 }
  0x7c   :  { %840 = vmatmul.mubr.f32.vlgmr.msra.gmra.mrb[28].mxu1 %v2368_v53 }
  0x7d   :  { %798 = vmatmul.mubr.f32.vlgmr.msra.gmra.mrb[0].mxu0 %v2356_v49  ;;  %1427 = vmatprep.mubr.msk.f32.mxu1 %vm392_vm0, %v2374_v57 }
  0x7e   :  { %1420 = vmatprep.mubr.msk.f32.mxu0 %vm392_vm0, %v2371_v54 }
  0x80   :  { %846 = vmatmul.mubr.f32.gmra.mrb[30].mxu1 %v2389_v0 }
  0x81   :  { %804 = vmatmul.mubr.f32.gmra.mrb[2].mxu0 %v2386_v63  ;;  %1428 = vmatprep.mubr.msk.f32.mxu1 %vm392_vm0, %v2404_v5 }
  0x82   :  { %1421 = vmatprep.mubr.msk.f32.mxu0 %vm392_vm0, %v2392_v1 }
  0x84   :  { %852 = vmatmul.mubr.f32.gmra.mrb[32].mxu1 %v2410_v7 }
  0x85   :  { %810 = vmatmul.mubr.f32.gmra.mrb[4].mxu0 %v2407_v6  ;;  %1429 = vmatprep.mubr.msk.f32.mxu1 %vm392_vm0, %v2436_v15 }
  0x86   :  { %1422 = vmatprep.mubr.msk.f32.mxu0 %vm392_vm0, %v2433_v14 }
  0x88   :  { %858 = vmatmul.mubr.f32.gmra.mrb[34].mxu1 %v2459_v23 }
  0x89   :  { %816 = vmatmul.mubr.f32.gmra.mrb[6].mxu0 %v2439_v16  ;;  %1430 = vmatprep.mubr.msk.f32.mxu1 %vm392_vm0, %v2465_v27 }
  0x8a   :  { %1423 = vmatprep.mubr.msk.f32.mxu0 %vm392_vm0, %v2462_v26 }
  0x8c   :  { %864 = vmatmul.mubr.f32.gmra.mrb[36].mxu1 %v2482_v33 }
  0x8d   :  { %822 = vmatmul.mubr.f32.gmra.mrb[8].mxu0 %v2479_v32  ;;  %1431 = vmatprep.mubr.msk.f32.mxu1 %vm392_vm0, %v2499_v46 }
  0x8e   :  { %1424 = vmatprep.mubr.msk.f32.mxu0 %vm392_vm0, %v2485_v34 }
  0x90   :  { %870 = vmatmul.mubr.f32.gmra.mrb[38].mxu1 %v2505_v51 }
  0x91   :  { %828 = vmatmul.mubr.f32.gmra.mrb[10].mxu0 %v2502_v50  ;;  %1432 = vmatprep.mubr.msk.f32.mxu1 %vm392_vm0, %v2525_v62 }
  0x92   :  { %1425 = vmatprep.mubr.msk.f32.mxu0 %vm392_vm0, %v2522_v61 }
  0x94   :  { %876 = vmatmul.mubr.f32.gmra.mrb[40].mxu1 %v2543_v8 }
  0x95   :  { %834 = vmatmul.mubr.f32.gmra.mrb[12].mxu0 %v2528_v2 }
 0x117   :  { %v501_v55 = vpop.f32.mrb[0].mxu1 }
 0x118   :  { %v2746_v56 = vpop.f32.mrb[1].mxu1 }
 0x11b   :  { %v2748_v21 = vpop.f32.mrb[2].mxu1 }
 0x11c   :  { %v2750_v25 = vpop.f32.mrb[3].mxu1 }
 0x11f   :  { %v2752_v47 = vpop.f32.mrb[4].mxu1 }
 0x120   :  { %v2754_v48 = vpop.f32.mrb[5].mxu1 }
 0x123   :  { %v2756_v49 = vpop.f32.mrb[6].mxu1 }
 0x124   :  { %v2758_v53 = vpop.f32.mrb[7].mxu1 }
 0x127   :  { %v2760_v54 = vpop.f32.mrb[8].mxu1 }
 0x128   :  { %v2762_v57 = vpop.f32.mrb[9].mxu1 }
 0x12b   :  { %v2764_v63 = vpop.f32.mrb[10].mxu1 }
 0x12c   :  { %v2766_v0 = vpop.f32.mrb[11].mxu1 }
 0x12f   :  { %v2768_v1 = vpop.f32.mrb[12].mxu1 }
 0x130   :  { %v2770_v5 = vpop.f32.mrb[13].mxu1 }
 0x133   :  { %v543_v6 = vpop.f32.mrb[14].mxu1 }
 0x134   :  { %v692_v7 = vpop.f32.mrb[14].mxu0  ;;  %v545_v14 = vpop.f32.mrb[15].mxu1 }
 0x135   :  { %v693_v15 = vadd.f32 %v692_v7, %v543_v6  ;;  %v694_v16 = vpop.f32.mrb[15].mxu0 }
 0x136   :  { %v695_v23 = vadd.f32 %v694_v16, %v545_v14 }
 0x137   :  { %v549_v26 = vpop.f32.mrb[16].mxu1 }
 0x138   :  { %v698_v27 = vpop.f32.mrb[16].mxu0  ;;  %v551_v32 = vpop.f32.mrb[17].mxu1 }
 0x139   :  { %v699_v33 = vadd.f32 %v698_v27, %v549_v26  ;;  %v700_v34 = vpop.f32.mrb[17].mxu0 }
 0x13a   :  { %v701_v46 = vadd.f32 %v700_v34, %v551_v32 }
 0x13b   :  { %v555_v50 = vpop.f32.mrb[18].mxu1 }
 0x13c   :  { %v704_v51 = vpop.f32.mrb[18].mxu0  ;;  %v557_v61 = vpop.f32.mrb[19].mxu1 }
 0x13d   :  { %v705_v62 = vadd.f32 %v704_v51, %v555_v50  ;;  %v706_v2 = vpop.f32.mrb[19].mxu0 }
 0x13e   :  { %v707_v8 = vadd.f32 %v706_v2, %v557_v61 }
 0x13f   :  { %v561_v20 = vpop.f32.mrb[20].mxu1 }
 0x140   :  { %v710_v22 = vpop.f32.mrb[20].mxu0  ;;  %v563_v24 = vpop.f32.mrb[21].mxu1 }
 0x141   :  { %v2772_v28 = vadd.f32 %v710_v22, %v561_v20  ;;  %v712_v31 = vpop.f32.mrb[21].mxu0 }
 0x142   :  { %v2774_v44 = vadd.f32 %v712_v31, %v563_v24 }
 0x143   :  { %v567_v45 = vpop.f32.mrb[22].mxu1 }
 0x144   :  { %v716_v35 = vpop.f32.mrb[22].mxu0  ;;  %v569_v52 = vpop.f32.mrb[23].mxu1 }
 0x145   :  { %v2776_v58 = vadd.f32 %v716_v35, %v567_v45  ;;  %v718_v29 = vpop.f32.mrb[23].mxu0 }
 0x146   :  { %v2778_v41 = vadd.f32 %v718_v29, %v569_v52 }
 0x147   :  { %v573_v3 = vpop.f32.mrb[24].mxu1 }
 0x148   :  { %v722_v30 = vpop.f32.mrb[24].mxu0  ;;  %v575_v36 = vpop.f32.mrb[25].mxu1 }
 0x149   :  { %v2780_v59 = vadd.f32 %v722_v30, %v573_v3  ;;  %v724_v4 = vpop.f32.mrb[25].mxu0 }
 0x14a   :  { %v2782_v37 = vadd.f32 %v724_v4, %v575_v36 }
 0x14b   :  { %v579_v9 = vpop.f32.mrb[26].mxu1 }
 0x14c   :  { %v728_v10 = vpop.f32.mrb[26].mxu0  ;;  %v581_v11 = vpop.f32.mrb[27].mxu1 }
 0x14d   :  { %v2784_v60 = vadd.f32 %v728_v10, %v579_v9  ;;  %v730_v42 = vpop.f32.mrb[27].mxu0 }
 0x14e   :  { %v2786_v12 = vadd.f32 %v730_v42, %v581_v11 }
 0x14f   :  { %v841_v13 = vpop.f32.mrb[28].mxu1 }
 0x150   :  { %v799_v38 = vpop.f32.mrb[0].mxu0  ;;  %v2788_v43 = vadd.f32 %v841_v13, %v693_v15  ;;  %v843_v17 = vpop.f32.mrb[29].mxu1 }
 0x151   :  { %v2790_v18 = vadd.f32 %v799_v38, %v501_v55  ;;  %v801_v39 = vpop.f32.mrb[1].mxu0  ;;  %v2792_v40 = vadd.f32 %v843_v17, %v695_v23 }
 0x152   :  { %v2795_v19 = vadd.f32 %v801_v39, %v2746_v56  ;;  %v967_v2 = vmul.f32 %v2788_v43, %v2788_v43 }
 0x153   :  { %v847_v6 = vpop.f32.mrb[30].mxu1  ;;  %v911_v7 = vsel %vm882_vm1, %v2792_v40, 0.0  ;;  %v968_v14 = vmul.f32 %v2792_v40, %v2792_v40 }
 0x154   :  { %v805_v16 = vpop.f32.mrb[2].mxu0  ;;  %v2801_v15 = vadd.f32 %v847_v6, %v699_v33  ;;  %v849_v26 = vpop.f32.mrb[31].mxu1  ;;  %v883_v55 = vsel %vm882_vm1, %v2795_v19, 0.0  ;;  %v912_v23 = vadd.f32 %v911_v7, %v2788_v43  ;;  %v954_v56 = vmul.f32 %v2795_v19, %v2795_v19 }
 0x155   :  { %v2809_v27 = vadd.f32 %v805_v16, %v2748_v21  ;;  %v807_v32 = vpop.f32.mrb[3].mxu0  ;;  %v2811_v34 = vadd.f32 %v849_v26, %v701_v46  ;;  %v884_v50 = vadd.f32 %v2790_v18, %v883_v55  ;;  %v1009_v33 = vsel %vm882_vm1, %v968_v14, 0.0 }
 0x156   :  { %v2816_v51 = vadd.f32 %v807_v32, %v2750_v25  ;;  %913 = vadd.xlane.f32.xlu1 %v912_v23  ;;  %v981_v61 = vsel %vm882_vm1, %v954_v56, 0.0  ;;  %v953_v21 = vmul.f32 %v2790_v18, %v2790_v18  ;;  %v1010_v31 = vadd.f32 %v1009_v33, %v967_v2 }
 0x157   :  { %885 = vadd.xlane.f32.xlu0 %v884_v50  ;;  %v853_v20 = vpop.f32.mrb[32].mxu1  ;;  %v955_v30 = vmul.f32 %v2809_v27, %v2809_v27  ;;  %v970_v11 = vmul.f32 %v2811_v34, %v2811_v34  ;;  %v969_v33 = vmul.f32 %v2801_v15, %v2801_v15 }
 0x158   :  { %v811_v46 = vpop.f32.mrb[4].mxu0  ;;  %v2823_v22 = vadd.f32 %v853_v20, %v705_v62  ;;  %v855_v24 = vpop.f32.mrb[33].mxu1  ;;  %v956_v25 = vmul.f32 %v2816_v51, %v2816_v51  ;;  %v982_v29 = vadd.f32 %v981_v61, %v953_v21  ;;  %v887_v62 = vsel %vm882_vm1, %v2816_v51, 0.0 }
 0x159   :  { %v2828_v45 = vadd.f32 %v811_v46, %v2752_v47  ;;  %v813_v35 = vpop.f32.mrb[5].mxu0  ;;  %v2830_v52 = vadd.f32 %v855_v24, %v707_v8  ;;  %v888_v17 = vadd.f32 %v2809_v27, %v887_v62  ;;  %v1013_v26 = vsel %vm882_vm1, %v970_v11, 0.0 }
 0x15a   :  { %v2833_v3 = vadd.f32 %v813_v35, %v2754_v48  ;;  %1011 = vadd.xlane.f32.xlu1 %v1010_v31  ;;  %v985_v36 = vsel %vm882_vm1, %v956_v25, 0.0  ;;  %v915_v48 = vsel %vm882_vm1, %v2811_v34, 0.0  ;;  %v1014_v20 = vadd.f32 %v1013_v26, %v969_v33 }
 0x15b   :  { %983 = vadd.xlane.f32.xlu0 %v982_v29  ;;  %v859_v4 = vpop.f32.mrb[34].mxu1  ;;  %v986_v10 = vadd.f32 %v985_v36, %v955_v30  ;;  %v916_v7 = vadd.f32 %v915_v48, %v2801_v15  ;;  %v919_v55 = vsel %vm882_vm1, %v2830_v52, 0.0  ;;  %v971_v29 = vmul.f32 %v2823_v22, %v2823_v22 }
 0x15c   :  { %v817_v47 = vpop.f32.mrb[6].mxu0  ;;  %v2841_v9 = vadd.f32 %v859_v4, %v2772_v28  ;;  %v861_v8 = vpop.f32.mrb[35].mxu1  ;;  %v891_v28 = vsel %vm882_vm1, %v2833_v3, 0.0  ;;  %v958_v32 = vmul.f32 %v2833_v3, %v2833_v3  ;;  %v920_v21 = vadd.f32 %v919_v55, %v2823_v22 }
 0x15d   :  { %v2848_v42 = vadd.f32 %v817_v47, %v2756_v49  ;;  %v819_v13 = vpop.f32.mrb[7].mxu0  ;;  %v2851_v38 = vadd.f32 %v861_v8, %v2774_v44  ;;  %v892_v44 = vadd.f32 %v2828_v45, %v891_v28 }
 0x15e   :  { %v2857_v39 = vadd.f32 %v819_v13, %v2758_v53  ;;  %987 = vadd.xlane.f32.xlu1 %v986_v10  ;;  %v989_v31 = vsel %vm882_vm1, %v958_v32, 0.0 }
 0x15f   :  { %889 = vadd.xlane.f32.xlu0 %v888_v17  ;;  %v865_v6 = vpop.f32.mrb[36].mxu1 }
 0x160   :  { %v823_v14 = vpop.f32.mrb[8].mxu0  ;;  %v2861_v49 = vadd.f32 %v865_v6, %v2776_v58  ;;  %v867_v16 = vpop.f32.mrb[37].mxu1  ;;  %v972_v58 = vmul.f32 %v2830_v52, %v2830_v52  ;;  %v895_v10 = vsel %vm882_vm1, %v2857_v39, 0.0  ;;  %v960_v48 = vmul.f32 %v2857_v39, %v2857_v39 }
 0x161   :  { %v2868_v53 = vadd.f32 %v823_v14, %v2760_v54  ;;  %v825_v23 = vpop.f32.mrb[9].mxu0  ;;  %v2871_v56 = vadd.f32 %v867_v16, %v2778_v41  ;;  %v973_v6 = vmul.f32 %v2841_v9, %v2841_v9 }
 0x162   :  { %v2878_v50 = vadd.f32 %v825_v23, %v2762_v57  ;;  %893 = vadd.xlane.f32.xlu1 %v892_v44  ;;  %v1017_v25 = vsel %vm882_vm1, %v972_v58, 0.0  ;;  %v993_v17 = vsel %vm882_vm1, %v960_v48, 0.0 }
 0x163   :  { %917 = vadd.xlane.f32.xlu0 %v916_v7  ;;  %v871_v54 = vpop.f32.mrb[38].mxu1  ;;  %v1018_v4 = vadd.f32 %v1017_v25, %v971_v29  ;;  %v927_v16 = vsel %vm882_vm1, %v2871_v56, 0.0  ;;  %v976_v44 = vmul.f32 %v2871_v56, %v2871_v56 }
 0x164   :  { %v829_v61 = vpop.f32.mrb[10].mxu0  ;;  %v2883_v2 = vadd.f32 %v871_v54, %v2780_v59  ;;  %v873_v41 = vpop.f32.mrb[39].mxu1  ;;  %v957_v59 = vmul.f32 %v2828_v45, %v2828_v45  ;;  %v899_v26 = vsel %vm882_vm1, %v2878_v50, 0.0  ;;  %v962_v55 = vmul.f32 %v2878_v50, %v2878_v50 }
 0x165   :  { %v2887_v46 = vadd.f32 %v829_v61, %v2764_v63  ;;  %v831_v24 = vpop.f32.mrb[11].mxu0  ;;  %v2890_v57 = vadd.f32 %v873_v41, %v2782_v37  ;;  %v928_v23 = vadd.f32 %v927_v16, %v2861_v49  ;;  %v900_v32 = vadd.f32 %v2868_v53, %v899_v26 }
 0x166   :  { %v2895_v35 = vadd.f32 %v831_v24, %v2766_v0  ;;  %921 = vadd.xlane.f32.xlu1 %v920_v21  ;;  %v990_v36 = vadd.f32 %v989_v31, %v957_v59  ;;  %v1025_v58 = vsel %vm882_vm1, %v976_v44, 0.0  ;;  %v997_v33 = vsel %vm882_vm1, %v962_v55, 0.0 }
 0x167   :  { %1015 = vadd.xlane.f32.xlu0 %v1014_v20  ;;  %v877_v63 = vpop.f32.mrb[40].mxu1  ;;  %v975_v54 = vmul.f32 %v2861_v49, %v2861_v49  ;;  %v961_v61 = vmul.f32 %v2868_v53, %v2868_v53  ;;  %v931_v31 = vsel %vm882_vm1, %v2890_v57, 0.0 }
 0x168   :  { %v835_v62 = vpop.f32.mrb[12].mxu0  ;;  %v2902_v37 = vadd.f32 %v877_v63, %v2784_v60  ;;  %v879_v30 = vpop.f32.mrb[41].mxu1  ;;  %v923_v60 = vsel %vm882_vm1, %v2851_v38, 0.0  ;;  %v903_v21 = vsel %vm882_vm1, %v2895_v35, 0.0  ;;  %v964_v24 = vmul.f32 %v2895_v35, %v2895_v35 }
 0x169   :  { %v2905_v47 = vadd.f32 %v835_v62, %v2768_v1  ;;  %v837_v0 = vpop.f32.mrb[13].mxu0  ;;  %v2908_v8 = vadd.f32 %v879_v30, %v2786_v12  ;;  %v974_v1 = vmul.f32 %v2851_v38, %v2851_v38  ;;  %v896_v12 = vadd.f32 %v2848_v42, %v895_v10 }
 0x16a   :  { %v2915_v11 = vadd.f32 %v837_v0, %v2770_v5  ;;  %1019 = vadd.xlane.f32.xlu1 %v1018_v4  ;;  %v924_v13 = vadd.f32 %v923_v60, %v2841_v9  ;;  %v959_v5 = vmul.f32 %v2848_v42, %v2848_v42  ;;  %v1026_v41 = vadd.f32 %v1025_v58, %v975_v54 }
 0x16b   :  { %991 = vadd.xlane.f32.xlu0 %v990_v36  ;;  %v1021_v28 = vsel %vm882_vm1, %v974_v1, 0.0  ;;  %v998_v20 = vadd.f32 %v997_v33, %v961_v61  ;;  %v904_v25 = vadd.f32 %v2887_v46, %v903_v21  ;;  %v932_v59 = vadd.f32 %v931_v31, %v2883_v2 }
 0x16c   :  { %v994_v7 = vadd.f32 %v993_v17, %v959_v5  ;;  %v1022_v14 = vadd.f32 %v1021_v28, %v973_v6  ;;  %v1001_v29 = vsel %vm882_vm1, %v964_v24, 0.0  ;;  %v1708_v63 = vmov 0  }
 0x16d   :  { %1679 = vset.pattern.permute.xlu1 %v1708_v63  ;;  %1678 = vset.pattern.permute.xlu0 %v1708_v63  ;;  %v907_v62 = vsel %vm882_vm1, %v2915_v11, 0.0  ;;  %v963_v30 = vmul.f32 %v2887_v46, %v2887_v46  ;;  %v966_v36 = vmul.f32 %v2915_v11, %v2915_v11  ;;  %v935_v10 = vsel %vm882_vm1, %v2908_v8, 0.0 }
 0x16e   :  { %897 = vadd.xlane.f32.xlu1 %v896_v12  ;;  %v908_v0 = vadd.f32 %v2905_v47, %v907_v62  ;;  %v980_v48 = vmul.f32 %v2908_v8, %v2908_v8  ;;  %v978_v1 = vmul.f32 %v2890_v57, %v2890_v57  ;;  %v965_v12 = vmul.f32 %v2905_v47, %v2905_v47 }
 0x16f   :  { %925 = vadd.xlane.f32.xlu0 %v924_v13  ;;  %v1002_v4 = vadd.f32 %v1001_v29, %v963_v30  ;;  %v1005_v60 = vsel %vm882_vm1, %v966_v36, 0.0  ;;  %v936_v13 = vadd.f32 %v935_v10, %v2902_v37  ;;  %v979_v6 = vmul.f32 %v2902_v37, %v2902_v37 }
 0x170   :  { %v1006_v17 = vadd.f32 %v1005_v60, %v965_v12  ;;  %v1033_v28 = vsel %vm882_vm1, %v980_v48, 0.0  ;;  %v1029_v5 = vsel %vm882_vm1, %v978_v1, 0.0 }
 0x172   :  { %995 = vadd.xlane.f32.xlu1 %v994_v7  ;;  %v977_v7 = vmul.f32 %v2883_v2, %v2883_v2 }
 0x173   :  { %1023 = vadd.xlane.f32.xlu0 %v1022_v14  ;;  %v1034_v14 = vadd.f32 %v1033_v28, %v979_v6 }
 0x174   :  { %v1030_v16 = vadd.f32 %v1029_v5, %v977_v7 }
 0x176   :  { %929 = vadd.xlane.f32.xlu1 %v928_v23 }
 0x177   :  { %901 = vadd.xlane.f32.xlu0 %v900_v32 }
 0x17a   :  { %1027 = vadd.xlane.f32.xlu1 %v1026_v41 }
 0x17b   :  { %999 = vadd.xlane.f32.xlu0 %v998_v20 }
 0x17e   :  { %905 = vadd.xlane.f32.xlu1 %v904_v25 }
 0x17f   :  { %933 = vadd.xlane.f32.xlu0 %v932_v59 }
 0x182   :  { %1003 = vadd.xlane.f32.xlu1 %v1002_v4 }
 0x183   :  { %909 = vadd.xlane.f32.xlu0 %v908_v0 }
 0x186   :  { %937 = vadd.xlane.f32.xlu1 %v936_v13 }
 0x187   :  { %1007 = vadd.xlane.f32.xlu0 %v1006_v17 }
 0x18a   :  { %1035 = vadd.xlane.f32.xlu1 %v1034_v14 }
 0x18b   :  { %1031 = vadd.xlane.f32.xlu0 %v1030_v16 }
 0x1e3   :  { %v914_v44 = vpop.xlane.xlu1 %913 }
 0x1e4   :  { %v886_v26 = vpop.xlane.xlu0 %885  ;;  %v946_v55 = vmul.f32 0.0051020407, %v914_v44 }
 0x1e5   :  { %v2977_v23 = vmul.f32 0.0051020407, %v886_v26 }
 0x1e6   :  { %v1058_v58 = vmul.f32 %v946_v55, %v946_v55 }
 0x1e7   :  { %v1012_v32 = vpop.xlane.xlu1 %1011  ;;  %v1051_v61 = vmul.f32 %v2977_v23, %v2977_v23 }
 0x1e8   :  { %v984_v33 = vpop.xlane.xlu0 %983  ;;  %v1044_v54 = vmul.f32 0.0051020407, %v1012_v32  ;;  %v1128_v32 = vld [vmem:[%s3255_s3 + $0x38] sm:$0xff] }
 0x1e9   :  { %v1037_v41 = vmul.f32 0.0051020407, %v984_v33 }
 0x1ea   :  { %v1072_v20 = vsub.f32 %v1044_v54, %v1058_v58 }
 0x1eb   :  { %v1065_v21 = vsub.f32 %v1037_v41, %v1051_v61  ;;  %v988_v24 = vpop.xlane.xlu1 %987  ;;  %v1121_v61 = vld [vmem:[%s3255_s3] sm:$0xff] }
 0x1ec   :  { %v1086_v31 = vmax.f32 %v1072_v20, 0.0  ;;  %v890_v25 = vpop.xlane.xlu0 %889  ;;  %v1038_v36 = vmul.f32 0.0051020407, %v988_v24 }
 0x1ed   :  { %v1079_v59 = vmax.f32 %v1065_v21, 0.0  ;;  %v2981_v29 = vmul.f32 0.0051020407, %v890_v25 }
 0x1ee   :  { %v1100_v63 = vadd.f32 0.001, %v1086_v31 }
 0x1ef   :  { %v1093_v62 = vadd.f32 0.001, %v1079_v59  ;;  %v1052_v30 = vmul.f32 %v2981_v29, %v2981_v29  ;;  %v894_v4 = vpop.xlane.xlu1 %893 }
 0x1f0   :  { %1680 = vrsqrt.f32 %v1100_v63  ;;  %v918_v0 = vpop.xlane.xlu0 %917  ;;  %v2991_v5 = vmul.f32 0.0051020407, %v894_v4  ;;  %v1156_v4 = vld [vmem:[%s3256_s4 + $0x38] sm:$0xff] }
 0x1f1   :  { %1682 = vrsqrt.f32 %v1093_v62  ;;  %v1066_v10 = vsub.f32 %v1038_v36, %v1052_v30  ;;  %v2985_v48 = vmul.f32 0.0051020407, %v918_v0 }
 0x1f2   :  { %v1053_v58 = vmul.f32 %v2991_v5, %v2991_v5 }
 0x1f3   :  { %v1080_v60 = vmax.f32 %v1066_v10, 0.0  ;;  %v922_v1 = vpop.xlane.xlu1 %921  ;;  %v1059_v28 = vmul.f32 %v2985_v48, %v2985_v48 }
 0x1f4   :  { %v1016_v12 = vpop.xlane.xlu0 %1015  ;;  %v2987_v13 = vmul.f32 0.0051020407, %v922_v1 }
 0x1f5   :  { %v1094_v17 = vadd.f32 0.001, %v1080_v60  ;;  %v1045_v6 = vmul.f32 0.0051020407, %v1016_v12 }
 0x1f6   :  { %v1060_v16 = vmul.f32 %v2987_v13, %v2987_v13 }
 0x1f7   :  { %1684 = vrsqrt.f32 %v1094_v17  ;;  %v1073_v7 = vsub.f32 %v1045_v6, %v1059_v28  ;;  %v1020_v14 = vpop.xlane.xlu1 %1019  ;;  %v1122_v6 = vld [vmem:[%s3255_s3 + $0x8] sm:$0xff] }
 0x1f8   :  { %v992_v44 = vpop.xlane.xlu0 %991  ;;  %v1046_v26 = vmul.f32 0.0051020407, %v1020_v14 }
 0x1f9   :  { %v1087_v33 = vmax.f32 %v1073_v7, 0.0  ;;  %v1039_v54 = vmul.f32 0.0051020407, %v992_v44 }
 0x1fa   :  { %v1681_v41 = vpop.eup %1680  ;;  %v1074_v20 = vsub.f32 %v1046_v26, %v1060_v16 }
 0x1fb   :  { %v1683_v21 = vpop.eup %1682  ;;  %v1101_v24 = vadd.f32 0.001, %v1087_v33  ;;  %v1067_v31 = vsub.f32 %v1039_v54, %v1053_v58  ;;  %v898_v25 = vpop.xlane.xlu1 %897  ;;  %v1142_v59 = vmul.f32 %v1681_v41, %v1128_v32 }
 0x1fc   :  { %v1088_v63 = vmax.f32 %v1074_v20, 0.0  ;;  %v926_v62 = vpop.xlane.xlu0 %925  ;;  %v3003_v30 = vmul.f32 0.0051020407, %v898_v25  ;;  %v1135_v36 = vmul.f32 %v1683_v21, %v1121_v61 }
 0x1fd   :  { %1686 = vrsqrt.f32 %v1101_v24  ;;  %v1081_v0 = vmax.f32 %v1067_v31, 0.0  ;;  %v3008_v10 = vmul.f32 0.0051020407, %v926_v62  ;;  %1228 = vperm.xlu1 %1679, %v1142_v59   ;;  %v1170_v60 = vmul.f32 %v1142_v59, %v946_v55  ;;  %v1129_v24 = vld [vmem:[%s3255_s3 + $0x40] sm:$0xff] }
 0x1fe   :  { %v1102_v1 = vadd.f32 0.001, %v1088_v63  ;;  %1193 = vperm.xlu0 %1678, %v1135_v36   ;;  %v1054_v7 = vmul.f32 %v3003_v30, %v3003_v30 }
 0x1ff   :  { %v1095_v12 = vadd.f32 0.001, %v1081_v0  ;;  %v996_v17 = vpop.xlane.xlu1 %995  ;;  %v1184_v28 = vsub.f32 %v1156_v4, %v1170_v60  ;;  %v1061_v26 = vmul.f32 %v3008_v10, %v3008_v10 }
 0x200   :  { %1688 = vrsqrt.f32 %v1102_v1  ;;  %v1024_v14 = vpop.xlane.xlu0 %1023  ;;  %v1040_v16 = vmul.f32 0.0051020407, %v996_v17  ;;  %v1130_v1 = vld [vmem:[%s3255_s3 + $0x48] sm:$0xff] }
 0x201   :  { %v1685_v44 = vpop.eup %1684  ;;  %v1047_v55 = vmul.f32 0.0051020407, %v1024_v14  ;;  %1690 = vrsqrt.f32 %v1095_v12  ;;  %v1163_v12 = vmul.f32 %v1135_v36, %v2977_v23  ;;  %v1150_v23 = vld [vmem:[%s3256_s4 + $0x8] sm:$0xff] }
 0x202   :  { %v1068_v32 = vsub.f32 %v1040_v16, %v1054_v7  ;;  %1326 = vperm.xlu0 %1678, %v1184_v28   ;;  %v1136_v58 = vmul.f32 %v1685_v44, %v1122_v6  ;;  %v1149_v6 = vld [vmem:[%s3256_s4] sm:$0xff] }
 0x203   :  { %v1075_v33 = vsub.f32 %v1047_v55, %v1061_v26  ;;  %v930_v54 = vpop.xlane.xlu1 %929 }
 0x204   :  { %v1082_v61 = vmax.f32 %v1068_v32, 0.0  ;;  %v902_v41 = vpop.xlane.xlu0 %901  ;;  %v3017_v20 = vmul.f32 0.0051020407, %v930_v54  ;;  %1198 = vperm.xlu1 %1679, %v1136_v58   ;;  %v1164_v16 = vmul.f32 %v1136_v58, %v2981_v29 }
 0x205   :  { %v3019_v21 = vmul.f32 0.0051020407, %v902_v41  ;;  %v1089_v59 = vmax.f32 %v1075_v33, 0.0 }
 0x206   :  { %v1096_v31 = vadd.f32 0.001, %v1082_v61  ;;  %v1062_v62 = vmul.f32 %v3017_v20, %v3017_v20  ;;  %v1177_v61 = vsub.f32 %v1149_v6, %v1163_v12  ;;  %v1178_v58 = vsub.f32 %v1150_v23, %v1164_v16  ;;  %v1158_v12 = vld [vmem:[%s3256_s4 + $0x48] sm:$0xff] }
 0x207   :  { %v1687_v25 = vpop.eup %1686  ;;  %v1028_v63 = vpop.xlane.xlu1 %1027  ;;  %v1055_v17 = vmul.f32 %v3019_v21, %v3019_v21  ;;  %v1103_v44 = vadd.f32 0.001, %v1089_v59 }
 0x208   :  { %v1000_v4 = vpop.xlane.xlu0 %999  ;;  %v1048_v0 = vmul.f32 0.0051020407, %v1028_v63  ;;  %v1143_v60 = vmul.f32 %v1687_v25, %v1129_v24  ;;  %1692 = vrsqrt.f32 %v1096_v31  ;;  %v1123_v24 = vld [vmem:[%s3255_s3 + $0x10] sm:$0xff] }
 0x209   :  { %v1041_v28 = vmul.f32 0.0051020407, %v1000_v4  ;;  %1694 = vrsqrt.f32 %v1103_v44 }
 0x20a   :  { %v1689_v7 = vpop.eup %1688  ;;  %v1076_v14 = vsub.f32 %v1048_v0, %v1062_v62  ;;  %1233 = vperm.xlu1 %1679, %v1143_v60   ;;  %v1171_v63 = vmul.f32 %v1143_v60, %v2985_v48 }
 0x20b   :  { %v1069_v26 = vsub.f32 %v1041_v28, %v1055_v17  ;;  %v906_v55 = vpop.xlane.xlu1 %905  ;;  %v1144_v32 = vmul.f32 %v1689_v7, %v1130_v1  ;;  %v1691_v41 = vpop.eup %1690  ;;  %v1157_v17 = vld [vmem:[%s3256_s4 + $0x40] sm:$0xff] }
 0x20c   :  { %v1090_v36 = vmax.f32 %v1076_v14, 0.0  ;;  %v934_v33 = vpop.xlane.xlu0 %933  ;;  %v3039_v54 = vmul.f32 0.0051020407, %v906_v55  ;;  %v1137_v1 = vmul.f32 %v1691_v41, %v1123_v24  ;;  %v1185_v44 = vsub.f32 %v1157_v17, %v1171_v63 }
 0x20d   :  { %1238 = vperm.xlu0 %1678, %v1144_v32   ;;  %v1083_v31 = vmax.f32 %v1069_v26, 0.0  ;;  %v1172_v59 = vmul.f32 %v1144_v32, %v2987_v13  ;;  %v1124_v26 = vld [vmem:[%s3255_s3 + $0x18] sm:$0xff]  ;;  %v3059_v55 = vmul.f32 0.0051020407, %v934_v33 }
 0x20e   :  { %v1104_v29 = vadd.f32 0.001, %v1090_v36  ;;  %1291 = vperm.xlu1 %1679, %v1177_v61   ;;  %v1056_v62 = vmul.f32 %v3039_v54, %v3039_v54 }
 0x20f   :  { %v1004_v25 = vpop.xlane.xlu1 %1003  ;;  %v1097_v13 = vadd.f32 0.001, %v1083_v31  ;;  %v1186_v60 = vsub.f32 %v1158_v12, %v1172_v59  ;;  %v1132_v31 = vld [vmem:[%s3255_s3 + $0x58] sm:$0xff] }
 0x210   :  { %1696 = vrsqrt.f32 %v1104_v29  ;;  %v910_v4 = vpop.xlane.xlu0 %909  ;;  %v1042_v0 = vmul.f32 0.0051020407, %v1004_v25  ;;  %v1063_v25 = vmul.f32 %v3059_v55, %v3059_v55 }
 0x211   :  { %1296 = vperm.xlu0 %1678, %v1178_v58   ;;  %v3061_v32 = vmul.f32 0.0051020407, %v910_v4  ;;  %1698 = vrsqrt.f32 %v1097_v13 }
 0x212   :  { %v1070_v28 = vsub.f32 %v1042_v0, %v1056_v62  ;;  %1203 = vperm.xlu1 %1679, %v1137_v1   ;;  %v1693_v6 = vpop.eup %1692  ;;  %v1131_v62 = vld [vmem:[%s3255_s3 + $0x50] sm:$0xff] }
 0x213   :  { %v938_v48 = vpop.xlane.xlu1 %937  ;;  %v1138_v41 = vmul.f32 %v1693_v6, %v1124_v26  ;;  %v1695_v33 = vpop.eup %1694  ;;  %v1057_v59 = vmul.f32 %v3061_v32, %v3061_v32  ;;  %v1152_v6 = vld [vmem:[%s3256_s4 + $0x18] sm:$0xff] }
 0x214   :  { %v1084_v7 = vmax.f32 %v1070_v28, 0.0  ;;  %v1008_v14 = vpop.xlane.xlu0 %1007  ;;  %v3054_v16 = vmul.f32 0.0051020407, %v938_v48 }
 0x215   :  { %1336 = vperm.xlu0 %1678, %v1186_v60   ;;  %v1043_v36 = vmul.f32 0.0051020407, %v1008_v14  ;;  %v1166_v13 = vmul.f32 %v1138_v41, %v3003_v30  ;;  %v1145_v60 = vmul.f32 %v1695_v33, %v1131_v62 }
 0x216   :  { %v1098_v23 = vadd.f32 0.001, %v1084_v7  ;;  %1331 = vperm.xlu1 %1679, %v1185_v44   ;;  %v1064_v24 = vmul.f32 %v3054_v16, %v3054_v16  ;;  %v1165_v7 = vmul.f32 %v1137_v1, %v2991_v5  ;;  %v1151_v44 = vld [vmem:[%s3256_s4 + $0x10] sm:$0xff]  ;;  %v1125_v1 = vld [vmem:[%s3255_s3 + $0x20] sm:$0xff] }
 0x217   :  { %v1036_v61 = vpop.xlane.xlu1 %1035  ;;  %v1071_v12 = vsub.f32 %v1043_v36, %v1057_v59  ;;  %v1159_v59 = vld [vmem:[%s3256_s4 + $0x50] sm:$0xff] }
 0x218   :  { %v1032_v29 = vpop.xlane.xlu0 %1031  ;;  %v1050_v58 = vmul.f32 0.0051020407, %v1036_v61  ;;  %1700 = vrsqrt.f32 %v1098_v23  ;;  %v1180_v61 = vsub.f32 %v1152_v6, %v1166_v13  ;;  %v1133_v13 = vld [vmem:[%s3255_s3 + $0x60] sm:$0xff] }
 0x219   :  { %v1049_v63 = vmul.f32 0.0051020407, %v1032_v29  ;;  %v1085_v23 = vmax.f32 %v1071_v12, 0.0 }
 0x21a   :  { %v1697_v4 = vpop.eup %1696  ;;  %v1078_v0 = vsub.f32 %v1050_v58, %v1064_v24  ;;  %1208 = vperm.xlu1 %1679, %v1138_v41   ;;  %v1179_v41 = vsub.f32 %v1151_v44, %v1165_v7  ;;  %v1160_v24 = vld [vmem:[%s3256_s4 + $0x58] sm:$0xff]  ;;  %v1153_v44 = vld [vmem:[%s3256_s4 + $0x20] sm:$0xff] }
 0x21b   :  { %v1077_v17 = vsub.f32 %v1049_v63, %v1063_v25  ;;  %v1146_v28 = vmul.f32 %v1697_v4, %v1132_v31  ;;  %v1699_v5 = vpop.eup %1698  ;;  %v1099_v29 = vadd.f32 0.001, %v1085_v23  ;;  %v1126_v25 = vld [vmem:[%s3255_s3 + $0x28] sm:$0xff] }
 0x21c   :  { %v1092_v48 = vmax.f32 %v1078_v0, 0.0  ;;  %v1139_v33 = vmul.f32 %v1699_v5, %v1125_v1  ;;  %v1134_v4 = vld [vmem:[%s3255_s3 + $0x68] sm:$0xff] }
 0x21d   :  { %v1091_v14 = vmax.f32 %v1077_v17, 0.0  ;;  %1248 = vperm.xlu0 %1678, %v1146_v28   ;;  %v1174_v30 = vmul.f32 %v1146_v28, %v3017_v20  ;;  %v1173_v20 = vmul.f32 %v1145_v60, %v3008_v10  ;;  %v1154_v17 = vld [vmem:[%s3256_s4 + $0x28] sm:$0xff] }
 0x21e   :  { %v1106_v26 = vadd.f32 0.001, %v1092_v48  ;;  %1243 = vperm.xlu1 %1679, %v1145_v60   ;;  %v1167_v7 = vmul.f32 %v1139_v33, %v3019_v21 }
 0x21f   :  { %v1105_v36 = vadd.f32 0.001, %v1091_v14  ;;  %v1188_v58 = vsub.f32 %v1160_v24, %v1174_v30  ;;  %v1187_v62 = vsub.f32 %v1159_v59, %v1173_v20  ;;  %v1161_v24 = vld [vmem:[%s3256_s4 + $0x60] sm:$0xff] }
 0x220   :  { %1702 = vrsqrt.f32 %v1106_v26  ;;  %v1127_v26 = vld [vmem:[%s3255_s3 + $0x30] sm:$0xff] }
 0x221   :  { %1306 = vperm.xlu0 %1678, %v1180_v61   ;;  %1704 = vrsqrt.f32 %v1105_v36  ;;  %v1155_v61 = vld [vmem:[%s3256_s4 + $0x30] sm:$0xff] }
 0x222   :  { %1301 = vperm.xlu1 %1679, %v1179_v41   ;;  %v1701_v31 = vpop.eup %1700  ;;  %1706 = vrsqrt.f32 %v1099_v29 }
 0x223   :  { %v1140_v63 = vmul.f32 %v1701_v31, %v1126_v25 }
 0x225   :  { %1346 = vperm.xlu0 %1678, %v1188_v58   ;;  %v1168_v12 = vmul.f32 %v1140_v63, %v3039_v54  ;;  %v1162_v54 = vld [vmem:[%s3256_s4 + $0x68] sm:$0xff] }
 0x226   :  { %1213 = vperm.xlu1 %1679, %v1139_v33  }
 0x227   :  { %v1182_v48 = vsub.f32 %v1154_v17, %v1168_v12 }
 0x22a   :  { %v1703_v0 = vpop.eup %1702  ;;  %1341 = vperm.xlu1 %1679, %v1187_v62  }
 0x22b   :  { %v1148_v10 = vmul.f32 %v1703_v0, %v1134_v4  ;;  %v1705_v28 = vpop.eup %1704 }
 0x22c   :  { %v1147_v6 = vmul.f32 %v1705_v28, %v1133_v13  ;;  %v1707_v14 = vpop.eup %1706 }
 0x22d   :  { %1258 = vperm.xlu0 %1678, %v1148_v10   ;;  %v1176_v60 = vmul.f32 %v1148_v10, %v3054_v16  ;;  %v1181_v16 = vsub.f32 %v1153_v44, %v1167_v7  ;;  %v1141_v36 = vmul.f32 %v1707_v14, %v1127_v26 }
 0x22e   :  { %1218 = vperm.xlu1 %1679, %v1140_v63   ;;  %v1175_v41 = vmul.f32 %v1147_v6, %v3059_v55 }
 0x22f   :  { %v1190_v23 = vsub.f32 %v1162_v54, %v1176_v60  ;;  %v1169_v21 = vmul.f32 %v1141_v36, %v3061_v32 }
 0x230   :  { %v1189_v5 = vsub.f32 %v1161_v24, %v1175_v41 }
 0x231   :  { %1316 = vperm.xlu0 %1678, %v1182_v48   ;;  %v1183_v30 = vsub.f32 %v1155_v61, %v1169_v21 }
 0x232   :  { %1253 = vperm.xlu1 %1679, %v1147_v6  }
 0x235   :  { %1356 = vperm.xlu0 %1678, %v1190_v23  }
 0x236   :  { %1311 = vperm.xlu1 %1679, %v1181_v16  }
 0x23a   :  { %1223 = vperm.xlu1 %1679, %v1141_v36  }
 0x23e   :  { %1321 = vperm.xlu1 %1679, %v1183_v30  }
 0x242   :  { %1351 = vperm.xlu1 %1679, %v1189_v5  }
 0x27c   :  { %v1229_v29 = vpop.permute.xlu1 %1228 }
 0x27d   :  { %v1194_v1 = vpop.permute.xlu0 %1193  ;;  %v1275_v58 = vmul.f32 %v1229_v29, %v2788_v43  ;;  %v1276_v32 = vmul.f32 %v1229_v29, %v2792_v40 }
 0x27e   :  { %v1261_v59 = vmul.f32 %v2790_v18, %v1194_v1  ;;  %v1262_v43 = vmul.f32 %v2795_v19, %v1194_v1 }
 0x281   :  { %v1327_v31 = vpop.permute.xlu0 %1326 }
 0x282   :  { %v1373_v33 = vadd.f32 %v1327_v31, %v1275_v58  ;;  %v1374_v20 = vadd.f32 %v1327_v31, %v1276_v32 }
 0x283   :  { %v1199_v55 = vpop.permute.xlu1 %1198 }
 0x284   :  { %1401 = vst [vmem:[%s3257_s5 + $0x70] sm:$0xff] %v1373_v33  ;;  %1402 = vst.msk [vmem:[%s3257_s5 + $0x78] sm:$0xff] %vm882_vm1, %v1374_v20  ;;  %v1263_v0 = vmul.f32 %v2809_v27, %v1199_v55  ;;  %v1264_v10 = vmul.f32 %v2816_v51, %v1199_v55 }
 0x289   :  { %v1234_v25 = vpop.permute.xlu1 %1233 }
 0x28a   :  { %v1277_v27 = vmul.f32 %v1234_v25, %v2801_v15  ;;  %v1278_v51 = vmul.f32 %v1234_v25, %v2811_v34 }
 0x28c   :  { %v1239_v63 = vpop.permute.xlu0 %1238 }
 0x28d   :  { %v1292_v40 = vpop.permute.xlu1 %1291  ;;  %v1279_v28 = vmul.f32 %v1239_v63, %v2823_v22  ;;  %v1280_v13 = vmul.f32 %v1239_v63, %v2830_v52 }
 0x28e   :  { %v1359_v62 = vadd.f32 %v1292_v40, %v1261_v59  ;;  %v1360_v4 = vadd.f32 %v1292_v40, %v1262_v43 }
 0x290   :  { %1387 = vst [vmem:[%s3257_s5] sm:$0xff] %v1359_v62  ;;  %1388 = vst.msk [vmem:[%s3257_s5 + $0x8] sm:$0xff] %vm882_vm1, %v1360_v4  ;;  %v1297_v18 = vpop.permute.xlu0 %1296 }
 0x291   :  { %v1361_v12 = vadd.f32 %v1297_v18, %v1263_v0  ;;  %v1362_v19 = vadd.f32 %v1297_v18, %v1264_v10  ;;  %v1204_v17 = vpop.permute.xlu1 %1203 }
 0x292   :  { %v1265_v26 = vmul.f32 %v2828_v45, %v1204_v17  ;;  %v1266_v23 = vmul.f32 %v2833_v3, %v1204_v17 }
 0x293   :  { %1389 = vst [vmem:[%s3257_s5 + $0x10] sm:$0xff] %v1361_v12  ;;  %1390 = vst.msk [vmem:[%s3257_s5 + $0x18] sm:$0xff] %vm882_vm1, %v1362_v19 }
 0x294   :  { %v1337_v48 = vpop.permute.xlu0 %1336 }
 0x295   :  { %v1377_v60 = vadd.f32 %v1337_v48, %v1279_v28  ;;  %v1378_v6 = vadd.f32 %v1337_v48, %v1280_v13  ;;  %v1332_v7 = vpop.permute.xlu1 %1331 }
 0x296   :  { %v1375_v22 = vadd.f32 %v1332_v7, %v1277_v27  ;;  %v1376_v54 = vadd.f32 %v1332_v7, %v1278_v51 }
 0x297   :  { %1405 = vst [vmem:[%s3257_s5 + $0x90] sm:$0xff] %v1377_v60  ;;  %1406 = vst.msk [vmem:[%s3257_s5 + $0x98] sm:$0xff] %vm882_vm1, %v1378_v6 }
 0x298   :  { %1403 = vst [vmem:[%s3257_s5 + $0x80] sm:$0xff] %v1375_v22  ;;  %1404 = vst.msk [vmem:[%s3257_s5 + $0x88] sm:$0xff] %vm882_vm1, %v1376_v54 }
 0x299   :  { %v1209_v15 = vpop.permute.xlu1 %1208 }
 0x29a   :  { %v1267_v14 = vmul.f32 %v2848_v42, %v1209_v15  ;;  %v1268_v44 = vmul.f32 %v2857_v39, %v1209_v15 }
 0x29c   :  { %v1249_v34 = vpop.permute.xlu0 %1248 }
 0x29d   :  { %v1244_v52 = vpop.permute.xlu1 %1243  ;;  %v1283_v24 = vmul.f32 %v1249_v34, %v2861_v49  ;;  %v1284_v5 = vmul.f32 %v1249_v34, %v2871_v56 }
 0x29e   :  { %v1281_v49 = vmul.f32 %v1244_v52, %v2841_v9  ;;  %v1282_v56 = vmul.f32 %v1244_v52, %v2851_v38 }
 0x2a0   :  { %v1307_v16 = vpop.permute.xlu0 %1306 }
 0x2a1   :  { %v1365_v36 = vadd.f32 %v1307_v16, %v1267_v14  ;;  %v1366_v21 = vadd.f32 %v1307_v16, %v1268_v44  ;;  %v1302_v61 = vpop.permute.xlu1 %1301 }
 0x2a2   :  { %v1363_v30 = vadd.f32 %v1302_v61, %v1265_v26  ;;  %v1364_v41 = vadd.f32 %v1302_v61, %v1266_v23 }
 0x2a3   :  { %1393 = vst [vmem:[%s3257_s5 + $0x30] sm:$0xff] %v1365_v36  ;;  %1394 = vst.msk [vmem:[%s3257_s5 + $0x38] sm:$0xff] %vm882_vm1, %v1366_v21 }
 0x2a4   :  { %1391 = vst [vmem:[%s3257_s5 + $0x20] sm:$0xff] %v1363_v30  ;;  %1392 = vst.msk [vmem:[%s3257_s5 + $0x28] sm:$0xff] %vm882_vm1, %v1364_v41  ;;  %v1347_v45 = vpop.permute.xlu0 %1346 }
 0x2a5   :  { %v1381_v3 = vadd.f32 %v1347_v45, %v1283_v24  ;;  %v1382_v42 = vadd.f32 %v1347_v45, %v1284_v5  ;;  %v1214_v39 = vpop.permute.xlu1 %1213 }
 0x2a7   :  { %1409 = vst [vmem:[%s3257_s5 + $0xb0] sm:$0xff] %v1381_v3  ;;  %1410 = vst.msk [vmem:[%s3257_s5 + $0xb8] sm:$0xff] %vm882_vm1, %v1382_v42 }
 0x2a9   :  { %v1342_v1 = vpop.permute.xlu1 %1341 }
 0x2aa   :  { %v1379_v29 = vadd.f32 %v1342_v1, %v1281_v49  ;;  %v1380_v58 = vadd.f32 %v1342_v1, %v1282_v56 }
 0x2ac   :  { %1407 = vst [vmem:[%s3257_s5 + $0xa0] sm:$0xff] %v1379_v29  ;;  %1408 = vst.msk [vmem:[%s3257_s5 + $0xa8] sm:$0xff] %vm882_vm1, %v1380_v58  ;;  %v1259_v32 = vpop.permute.xlu0 %1258 }
 0x2ad   :  { %v1219_v31 = vpop.permute.xlu1 %1218  ;;  %v1287_v59 = vmul.f32 %v1259_v32, %v2902_v37  ;;  %v1288_v43 = vmul.f32 %v1259_v32, %v2908_v8 }
 0x2ae   :  { %v1271_v33 = vmul.f32 %v2887_v46, %v1219_v31  ;;  %v1272_v9 = vmul.f32 %v2895_v35, %v1219_v31  ;;  %v1269_v46 = vmul.f32 %v2868_v53, %v1214_v39  ;;  %v1270_v35 = vmul.f32 %v2878_v50, %v1214_v39 }
 0x2b0   :  { %v1317_v20 = vpop.permute.xlu0 %1316 }
 0x2b1   :  { %v1369_v38 = vadd.f32 %v1317_v20, %v1271_v33  ;;  %v1370_v55 = vadd.f32 %v1317_v20, %v1272_v9  ;;  %v1254_v25 = vpop.permute.xlu1 %1253 }
 0x2b2   :  { %v1285_v19 = vmul.f32 %v1254_v25, %v2883_v2  ;;  %v1286_v17 = vmul.f32 %v1254_v25, %v2890_v57 }
 0x2b3   :  { %1397 = vst [vmem:[%s3257_s5 + $0x50] sm:$0xff] %v1369_v38  ;;  %1398 = vst.msk [vmem:[%s3257_s5 + $0x58] sm:$0xff] %vm882_vm1, %v1370_v55 }
 0x2b4   :  { %v1357_v63 = vpop.permute.xlu0 %1356 }
 0x2b5   :  { %v1385_v40 = vadd.f32 %v1357_v63, %v1287_v59  ;;  %v1386_v62 = vadd.f32 %v1357_v63, %v1288_v43  ;;  %v1312_v4 = vpop.permute.xlu1 %1311 }
 0x2b6   :  { %v1367_v37 = vadd.f32 %v1312_v4, %v1269_v46  ;;  %v1368_v0 = vadd.f32 %v1312_v4, %v1270_v35 }
 0x2b7   :  { %1413 = vst [vmem:[%s3257_s5 + $0xd0] sm:$0xff] %v1385_v40  ;;  %1414 = vst.msk [vmem:[%s3257_s5 + $0xd8] sm:$0xff] %vm882_vm1, %v1386_v62 }
 0x2b8   :  { %1395 = vst [vmem:[%s3257_s5 + $0x40] sm:$0xff] %v1367_v37  ;;  %1396 = vst.msk [vmem:[%s3257_s5 + $0x48] sm:$0xff] %vm882_vm1, %v1368_v0 }
 0x2b9   :  { %v1224_v53 = vpop.permute.xlu1 %1223 }
 0x2ba   :  { %v1273_v50 = vmul.f32 %v2905_v47, %v1224_v53  ;;  %v1274_v8 = vmul.f32 %v2915_v11, %v1224_v53 }
 0x2bd   :  { %v1322_v10 = vpop.permute.xlu1 %1321 }
 0x2be   :  { %v1371_v18 = vadd.f32 %v1322_v10, %v1273_v50  ;;  %v1372_v12 = vadd.f32 %v1322_v10, %v1274_v8 }
 0x2c0   :  { %1399 = vst [vmem:[%s3257_s5 + $0x60] sm:$0xff] %v1371_v18  ;;  %1400 = vst.msk [vmem:[%s3257_s5 + $0x68] sm:$0xff] %vm882_vm1, %v1372_v12 }
 0x2c1   :  { %v1352_v28 = vpop.permute.xlu1 %1351 }
 0x2c2   :  { %v1383_v47 = vadd.f32 %v1352_v28, %v1285_v19  ;;  %v1384_v13 = vadd.f32 %v1352_v28, %v1286_v17 }
 0x2c4   :  { %1411 = vst [vmem:[%s3257_s5 + $0xc0] sm:$0xff] %v1383_v47  ;;  %1412 = vst.msk [vmem:[%s3257_s5 + $0xc8] sm:$0xff] %vm882_vm1, %v1384_v13 }

</bundles_post_ra>
